<compile_context>
chip_gen: v7x
topology: tpu7x:2x2x1
jax: 0.10.0
libtpu: 0.0.40
codegen_flags: <defaults>
</compile_context>

<pallas_src>
import functools

import jax
import jax.numpy as jnp
from jax.experimental import pallas as pl
from jax.experimental.pallas import tpu as pltpu


# ----------------------------------------------------------------------------
# Kernel (one batch element per grid step, all heads fused in-body)
# ----------------------------------------------------------------------------
def _mha_block_kernel(x_ref, pmat_ref, gamma_ref, beta_ref,
                      wqkv_ref, bqkv_ref, wo_ref, bo_ref, out_ref,
                      *, eps, num_heads):
    c = x_ref.shape[2]
    hc = num_heads * c

    # -------- GroupNorm (two-pass variance for numerical parity) -------------
    xc = x_ref[0]                                              # (HW, C) f32
    pmat = pmat_ref[...]                                       # (C, C) group-avg matrix
    row_sum = jnp.sum(xc, axis=0, keepdims=True)               # (1, C)
    mean = jnp.dot(row_sum, pmat, preferred_element_type=jnp.float32)
    xm = xc - mean
    sq_sum = jnp.sum(xm * xm, axis=0, keepdims=True)           # (1, C)
    var = jnp.dot(sq_sum, pmat, preferred_element_type=jnp.float32)
    inv = jax.lax.rsqrt(var + eps)
    xn = (xm * (gamma_ref[...] * inv) + beta_ref[...]).astype(jnp.bfloat16)

    # -------- fused QKV projection for ALL heads (one lane-dense matmul) -----
    # wqkv: (C, 3*heads*C), ordered [Q heads | K heads | V heads]; the 1/sqrt(C)
    # attention scale is pre-folded into the Q columns/bias by the wrapper.
    qkv = (jnp.dot(xn, wqkv_ref[...], preferred_element_type=jnp.float32)
           + bqkv_ref[...]).astype(jnp.bfloat16)               # (HW, 3*heads*C)

    # -------- per-head attention (static loop, heads folded into the body) ---
    outs = []
    for h in range(num_heads):
        q = qkv[:, h * c:(h + 1) * c]                          # (HW, C) bf16
        k = qkv[:, hc + h * c:hc + (h + 1) * c]
        v = qkv[:, 2 * hc + h * c:2 * hc + (h + 1) * c]
        # scores = q @ k^T (contract the channel dim of both; no transpose)
        s = jax.lax.dot_general(q, k, (((1,), (1,)), ((), ())),
                                preferred_element_type=jnp.float32)   # (HW, HW)
        m = jnp.max(s, axis=-1, keepdims=True)
        e = jnp.exp(s - m)                                     # EUP
        p = e / jnp.sum(e, axis=-1, keepdims=True)             # exact softmax
        outs.append(jnp.dot(p.astype(jnp.bfloat16), v,
                            preferred_element_type=jnp.float32))      # (HW, C)

    # -------- output projection: ONE K = heads*C contraction + bias + residual
    o_cat = jnp.concatenate(outs, axis=-1).astype(jnp.bfloat16)       # (HW, heads*C)
    out = jnp.dot(o_cat, wo_ref[...], preferred_element_type=jnp.float32)
    out_ref[0] = (out + bo_ref[...] + xc).astype(out_ref.dtype)


# ----------------------------------------------------------------------------
# Wrapper
# ----------------------------------------------------------------------------
def mha_block_forward(x_nchw, params, *, num_heads, num_groups, eps=1e-5):
    """Forward pass of MultiHeadAttentionBlock. x: (B, C, H, W) -> (B, C, H, W)."""
    B, C, H, W = x_nchw.shape
    assert C % num_groups == 0
    HW = H * W
    cg = C // num_groups
    HC = num_heads * C
    scale = float(C) ** -0.5
    bf = jnp.bfloat16

    # NCHW -> rows (B, HW, C); done once at the boundary.
    x_rows = jnp.transpose(x_nchw, (0, 2, 3, 1)).reshape(B, HW, C).astype(jnp.float32)

    # Group-averaging matrix: (s @ pmat)[c] = mean over the group containing c.
    gid = jnp.arange(C) // cg
    pmat = (gid[:, None] == gid[None, :]).astype(jnp.float32) / float(HW * cg)

    # Pack per-head weights into one lane-dense QKV weight, fold the attention
    # scale into the Q weights/bias (one-time parameter-prep, not per-score).
    def _pack_w(w):   # (heads, C, C) -> (C, heads*C)
        return jnp.transpose(w, (1, 0, 2)).reshape(C, HC)

    def _pack_b(b):   # (heads, 1, C) -> (1, heads*C)
        return jnp.transpose(b, (1, 0, 2)).reshape(1, HC)

    w_qkv = jnp.concatenate([_pack_w(params["wq"]) * scale,
                             _pack_w(params["wk"]),
                             _pack_w(params["wv"])], axis=1).astype(bf)   # (C, 3*HC)
    b_qkv = jnp.concatenate([_pack_b(params["bq"]) * scale,
                             _pack_b(params["bk"]),
                             _pack_b(params["bv"])], axis=1).astype(jnp.float32)
    w_out = params["wo"].reshape(HC, C).astype(bf)            # heads stacked along K

    kernel = functools.partial(_mha_block_kernel, eps=eps, num_heads=num_heads)

    out_rows = pl.pallas_call(
        kernel,
        grid=(B,),
        in_specs=[
            pl.BlockSpec((1, HW, C), lambda b: (b, 0, 0)),    # x
            pl.BlockSpec((C, C), lambda b: (0, 0)),           # pmat (resident)
            pl.BlockSpec((1, C), lambda b: (0, 0)),           # gamma
            pl.BlockSpec((1, C), lambda b: (0, 0)),           # beta
            pl.BlockSpec((C, 3 * HC), lambda b: (0, 0)),      # fused QKV weight
            pl.BlockSpec((1, 3 * HC), lambda b: (0, 0)),      # fused QKV bias
            pl.BlockSpec((HC, C), lambda b: (0, 0)),          # output projection weight
            pl.BlockSpec((1, C), lambda b: (0, 0)),           # output projection bias
        ],
        out_specs=pl.BlockSpec((1, HW, C), lambda b: (b, 0, 0)),
        out_shape=jax.ShapeDtypeStruct((B, HW, C), jnp.float32),
        compiler_params=pltpu.CompilerParams(
            dimension_semantics=("parallel",),
            vmem_limit_bytes=32 * 1024 * 1024),
    )(x_rows, pmat, params["gamma"], params["beta"],
      w_qkv, b_qkv, w_out, params["bo"])

    return jnp.transpose(out_rows.reshape(B, H, W, C), (0, 3, 1, 2))


# ----------------------------------------------------------------------------
# Parameters (equivalent to nn.Conv2d 1x1 / nn.GroupNorm defaults)
# ----------------------------------------------------------------------------
def init_params(key, C, num_heads):
    ks = jax.random.split(key, 8)
    bq = 1.0 / (C ** 0.5)                  # to_qkv fan_in = C
    bo_b = 1.0 / ((num_heads * C) ** 0.5)  # to_out fan_in = heads*C
    return {
        "wq": jax.random.uniform(ks[0], (num_heads, C, C), jnp.float32, -bq, bq),
        "wk": jax.random.uniform(ks[1], (num_heads, C, C), jnp.float32, -bq, bq),
        "wv": jax.random.uniform(ks[2], (num_heads, C, C), jnp.float32, -bq, bq),
        "bq": jax.random.uniform(ks[3], (num_heads, 1, C), jnp.float32, -bq, bq),
        "bk": jax.random.uniform(ks[4], (num_heads, 1, C), jnp.float32, -bq, bq),
        "bv": jax.random.uniform(ks[5], (num_heads, 1, C), jnp.float32, -bq, bq),
        "wo": jax.random.uniform(ks[6], (num_heads, C, C), jnp.float32, -bo_b, bo_b),
        "bo": jax.random.uniform(ks[7], (1, C), jnp.float32, -bo_b, bo_b),
        "gamma": jnp.ones((1, C), jnp.float32),   # nn.GroupNorm default affine init
        "beta": jnp.zeros((1, C), jnp.float32),
    }


# ----------------------------------------------------------------------------
# Pure-JAX reference (same math as the PyTorch module) for a sanity check
# ----------------------------------------------------------------------------
def mha_block_reference(x, params, *, num_heads, num_groups, eps=1e-5):
    B, C, H, W = x.shape
    HW = H * W
    cg = C // num_groups
    xg = x.reshape(B, num_groups, cg * HW)
    mean = jnp.mean(xg, axis=-1, keepdims=True)
    var = jnp.mean((xg - mean) ** 2, axis=-1, keepdims=True)
    xn = ((xg - mean) / jnp.sqrt(var + eps)).reshape(B, C, H, W)
    xn = xn * params["gamma"].reshape(1, C, 1, 1) + params["beta"].reshape(1, C, 1, 1)
    xr = jnp.transpose(xn, (0, 2, 3, 1)).reshape(B, HW, C)
    out = jnp.zeros((B, HW, C), jnp.float32)
    for h in range(num_heads):
        q = xr @ params["wq"][h] + params["bq"][h]
        k = xr @ params["wk"][h] + params["bk"][h]
        v = xr @ params["wv"][h] + params["bv"][h]
        s = jnp.einsum("bqc,bkc->bqk", q, k) * (C ** -0.5)
        p = jax.nn.softmax(s, axis=-1)
        o = jnp.einsum("bqk,bkc->bqc", p, v)
        out = out + o @ params["wo"][h]
    out = out + params["bo"] + jnp.transpose(x, (0, 2, 3, 1)).reshape(B, HW, C)
    return jnp.transpose(out.reshape(B, H, W, C), (0, 3, 1, 2))


if __name__ == "__main__":
    key = jax.random.PRNGKey(0)
    kx, kp = jax.random.split(key)

    B, C, H, W = 2, 32, 8, 8          # (N, in_channels, H, W)
    num_heads = 4                     # module default
    num_groups = 8                    # GroupNorm groups (C % num_groups == 0)

    x = jax.random.normal(kx, (B, C, H, W), jnp.float32)
    params = init_params(kp, C, num_heads)

    fwd = jax.jit(functools.partial(
        mha_block_forward, num_heads=num_heads, num_groups=num_groups))
    out = fwd(x, params)
    out = jax.block_until_ready(out)

    assert out.shape == (B, C, H, W)

    # Tolerance covers bf16 MXU operands (f32 accumulation, exact softmax divide).
    ref = mha_block_reference(x, params, num_heads=num_heads, num_groups=num_groups)
    err = float(jnp.max(jnp.abs(out - ref)))
    assert err < 5e-2, f"max abs err {err}"

    print("KERNEL_OK")
</pallas_src>

<mosaic_0001>
module attributes {stable_mosaic.version = 11 : i64} {
  func.func @_mha_block_kernel(%arg0: i32, %arg1: memref<1x64x32xf32, #tpu.memory_space<vmem>>, %arg2: memref<32x32xf32, #tpu.memory_space<vmem>>, %arg3: memref<1x32xf32, #tpu.memory_space<vmem>>, %arg4: memref<1x32xf32, #tpu.memory_space<vmem>>, %arg5: memref<32x384xbf16, #tpu.memory_space<vmem>>, %arg6: memref<1x384xf32, #tpu.memory_space<vmem>>, %arg7: memref<128x32xbf16, #tpu.memory_space<vmem>>, %arg8: memref<1x32xf32, #tpu.memory_space<vmem>>, %arg9: memref<1x64x32xf32, #tpu.memory_space<vmem>>) attributes {dimension_semantics = [#tpu.dimension_semantics<parallel>], iteration_bounds = array<i64: 2>, scalar_prefetch = 0 : i64, scratch_operands = 0 : i64, tpu.core_type = #tpu.core_type<tc>, window_params = [{transform_indices = @transform_0, window_bounds = array<i64: 1, 64, 32>}, {pipeline_mode = #tpu.pipeline_mode<synchronous>, transform_indices = @transform_1, window_bounds = array<i64: 32, 32>}, {pipeline_mode = #tpu.pipeline_mode<synchronous>, transform_indices = @transform_2, window_bounds = array<i64: 1, 32>}, {pipeline_mode = #tpu.pipeline_mode<synchronous>, transform_indices = @transform_3, window_bounds = array<i64: 1, 32>}, {pipeline_mode = #tpu.pipeline_mode<synchronous>, transform_indices = @transform_4, window_bounds = array<i64: 32, 384>}, {pipeline_mode = #tpu.pipeline_mode<synchronous>, transform_indices = @transform_5, window_bounds = array<i64: 1, 384>}, {pipeline_mode = #tpu.pipeline_mode<synchronous>, transform_indices = @transform_6, window_bounds = array<i64: 128, 32>}, {pipeline_mode = #tpu.pipeline_mode<synchronous>, transform_indices = @transform_7, window_bounds = array<i64: 1, 32>}, {transform_indices = @transform_8, window_bounds = array<i64: 1, 64, 32>}]} {
    %c0 = arith.constant 0 : index
    %c0_0 = arith.constant 0 : index
    %c0_1 = arith.constant 0 : index
    %0 = vector.load %arg1[%c0, %c0_0, %c0_1] : memref<1x64x32xf32, #tpu.memory_space<vmem>>, vector<1x64x32xf32>
    %1 = vector.shape_cast %0 : vector<1x64x32xf32> to vector<64x32xf32>
    %c0_2 = arith.constant 0 : index
    %c0_3 = arith.constant 0 : index
    %2 = vector.load %arg2[%c0_2, %c0_3] : memref<32x32xf32, #tpu.memory_space<vmem>>, vector<32x32xf32>
    %cst = arith.constant dense<0.000000e+00> : vector<32xf32>
    %3 = vector.multi_reduction <add>, %1, %cst [0] : vector<64x32xf32> to vector<32xf32>
    %4 = vector.shape_cast %3 : vector<32xf32> to vector<1x32xf32>
    %cst_4 = arith.constant dense<0.000000e+00> : vector<1x32xf32>
    %5 = tpu.matmul %4, %2, %cst_4 {dimension_numbers = #tpu.dot_dimension_numbers<[1], [0], [0], [1], [0, 0, 1, 1], [], []>} : vector<1x32xf32>, vector<32x32xf32>, vector<1x32xf32> -> vector<1x32xf32>
    %6 = vector.broadcast %5 : vector<1x32xf32> to vector<64x32xf32>
    %7 = arith.subf %1, %6 : vector<64x32xf32>
    %8 = arith.mulf %7, %7 : vector<64x32xf32>
    %cst_5 = arith.constant dense<0.000000e+00> : vector<32xf32>
    %9 = vector.multi_reduction <add>, %8, %cst_5 [0] : vector<64x32xf32> to vector<32xf32>
    %10 = vector.shape_cast %9 : vector<32xf32> to vector<1x32xf32>
    %cst_6 = arith.constant dense<0.000000e+00> : vector<1x32xf32>
    %11 = tpu.matmul %10, %2, %cst_6 {dimension_numbers = #tpu.dot_dimension_numbers<[1], [0], [0], [1], [0, 0, 1, 1], [], []>} : vector<1x32xf32>, vector<32x32xf32>, vector<1x32xf32> -> vector<1x32xf32>
    %cst_7 = arith.constant 9.99999974E-6 : f32
    %12 = vector.broadcast %cst_7 : f32 to vector<1x32xf32>
    %13 = arith.addf %11, %12 : vector<1x32xf32>
    %14 = math.rsqrt %13 : vector<1x32xf32>
    %c0_8 = arith.constant 0 : index
    %c0_9 = arith.constant 0 : index
    %15 = vector.load %arg3[%c0_8, %c0_9] : memref<1x32xf32, #tpu.memory_space<vmem>>, vector<1x32xf32>
    %16 = arith.mulf %15, %14 : vector<1x32xf32>
    %17 = vector.broadcast %16 : vector<1x32xf32> to vector<64x32xf32>
    %18 = arith.mulf %7, %17 : vector<64x32xf32>
    %c0_10 = arith.constant 0 : index
    %c0_11 = arith.constant 0 : index
    %19 = vector.load %arg4[%c0_10, %c0_11] : memref<1x32xf32, #tpu.memory_space<vmem>>, vector<1x32xf32>
    %20 = vector.broadcast %19 : vector<1x32xf32> to vector<64x32xf32>
    %21 = arith.addf %18, %20 : vector<64x32xf32>
    %22 = arith.truncf %21 : vector<64x32xf32> to vector<64x32xbf16>
    %c0_12 = arith.constant 0 : index
    %c0_13 = arith.constant 0 : index
    %23 = vector.load %arg5[%c0_12, %c0_13] : memref<32x384xbf16, #tpu.memory_space<vmem>>, vector<32x384xbf16>
    %cst_14 = arith.constant dense<0.000000e+00> : vector<64x384xf32>
    %24 = tpu.matmul %22, %23, %cst_14 {dimension_numbers = #tpu.dot_dimension_numbers<[1], [0], [0], [1], [0, 0, 1, 1], [], []>} : vector<64x32xbf16>, vector<32x384xbf16>, vector<64x384xf32> -> vector<64x384xf32>
    %c0_15 = arith.constant 0 : index
    %c0_16 = arith.constant 0 : index
    %25 = vector.load %arg6[%c0_15, %c0_16] : memref<1x384xf32, #tpu.memory_space<vmem>>, vector<1x384xf32>
    %26 = vector.broadcast %25 : vector<1x384xf32> to vector<64x384xf32>
    %27 = arith.addf %24, %26 : vector<64x384xf32>
    %28 = arith.truncf %27 : vector<64x384xf32> to vector<64x384xbf16>
    %29 = vector.extract_strided_slice %28 {offsets = [0, 0], sizes = [64, 32], strides = [1, 1]} : vector<64x384xbf16> to vector<64x32xbf16>
    %30 = vector.extract_strided_slice %28 {offsets = [0, 128], sizes = [64, 32], strides = [1, 1]} : vector<64x384xbf16> to vector<64x32xbf16>
    %31 = vector.extract_strided_slice %28 {offsets = [0, 256], sizes = [64, 32], strides = [1, 1]} : vector<64x384xbf16> to vector<64x32xbf16>
    %cst_17 = arith.constant dense<0.000000e+00> : vector<64x64xf32>
    %32 = tpu.matmul %29, %30, %cst_17 {dimension_numbers = #tpu.dot_dimension_numbers<[1], [1], [0], [0], [0, 0, 1, 0], [], []>} : vector<64x32xbf16>, vector<64x32xbf16>, vector<64x64xf32> -> vector<64x64xf32>
    %cst_18 = arith.constant dense<0xFF800000> : vector<64xf32>
    %33 = vector.multi_reduction <maximumf>, %32, %cst_18 [1] : vector<64x64xf32> to vector<64xf32>
    %34 = vector.shape_cast %33 : vector<64xf32> to vector<64x1xf32>
    %35 = vector.broadcast %34 : vector<64x1xf32> to vector<64x64xf32>
    %36 = arith.subf %32, %35 : vector<64x64xf32>
    %37 = math.exp %36 : vector<64x64xf32>
    %cst_19 = arith.constant dense<0.000000e+00> : vector<64xf32>
    %38 = vector.multi_reduction <add>, %37, %cst_19 [1] : vector<64x64xf32> to vector<64xf32>
    %39 = vector.shape_cast %38 : vector<64xf32> to vector<64x1xf32>
    %40 = vector.broadcast %39 : vector<64x1xf32> to vector<64x64xf32>
    %41 = arith.divf %37, %40 : vector<64x64xf32>
    %42 = arith.truncf %41 : vector<64x64xf32> to vector<64x64xbf16>
    %cst_20 = arith.constant dense<0.000000e+00> : vector<64x32xf32>
    %43 = tpu.matmul %42, %31, %cst_20 {dimension_numbers = #tpu.dot_dimension_numbers<[1], [0], [0], [1], [0, 0, 1, 1], [], []>} : vector<64x64xbf16>, vector<64x32xbf16>, vector<64x32xf32> -> vector<64x32xf32>
    %44 = vector.extract_strided_slice %28 {offsets = [0, 32], sizes = [64, 32], strides = [1, 1]} : vector<64x384xbf16> to vector<64x32xbf16>
    %45 = vector.extract_strided_slice %28 {offsets = [0, 160], sizes = [64, 32], strides = [1, 1]} : vector<64x384xbf16> to vector<64x32xbf16>
    %46 = vector.extract_strided_slice %28 {offsets = [0, 288], sizes = [64, 32], strides = [1, 1]} : vector<64x384xbf16> to vector<64x32xbf16>
    %cst_21 = arith.constant dense<0.000000e+00> : vector<64x64xf32>
    %47 = tpu.matmul %44, %45, %cst_21 {dimension_numbers = #tpu.dot_dimension_numbers<[1], [1], [0], [0], [0, 0, 1, 0], [], []>} : vector<64x32xbf16>, vector<64x32xbf16>, vector<64x64xf32> -> vector<64x64xf32>
    %cst_22 = arith.constant dense<0xFF800000> : vector<64xf32>
    %48 = vector.multi_reduction <maximumf>, %47, %cst_22 [1] : vector<64x64xf32> to vector<64xf32>
    %49 = vector.shape_cast %48 : vector<64xf32> to vector<64x1xf32>
    %50 = vector.broadcast %49 : vector<64x1xf32> to vector<64x64xf32>
    %51 = arith.subf %47, %50 : vector<64x64xf32>
    %52 = math.exp %51 : vector<64x64xf32>
    %cst_23 = arith.constant dense<0.000000e+00> : vector<64xf32>
    %53 = vector.multi_reduction <add>, %52, %cst_23 [1] : vector<64x64xf32> to vector<64xf32>
    %54 = vector.shape_cast %53 : vector<64xf32> to vector<64x1xf32>
    %55 = vector.broadcast %54 : vector<64x1xf32> to vector<64x64xf32>
    %56 = arith.divf %52, %55 : vector<64x64xf32>
    %57 = arith.truncf %56 : vector<64x64xf32> to vector<64x64xbf16>
    %cst_24 = arith.constant dense<0.000000e+00> : vector<64x32xf32>
    %58 = tpu.matmul %57, %46, %cst_24 {dimension_numbers = #tpu.dot_dimension_numbers<[1], [0], [0], [1], [0, 0, 1, 1], [], []>} : vector<64x64xbf16>, vector<64x32xbf16>, vector<64x32xf32> -> vector<64x32xf32>
    %59 = vector.extract_strided_slice %28 {offsets = [0, 64], sizes = [64, 32], strides = [1, 1]} : vector<64x384xbf16> to vector<64x32xbf16>
    %60 = vector.extract_strided_slice %28 {offsets = [0, 192], sizes = [64, 32], strides = [1, 1]} : vector<64x384xbf16> to vector<64x32xbf16>
    %61 = vector.extract_strided_slice %28 {offsets = [0, 320], sizes = [64, 32], strides = [1, 1]} : vector<64x384xbf16> to vector<64x32xbf16>
    %cst_25 = arith.constant dense<0.000000e+00> : vector<64x64xf32>
    %62 = tpu.matmul %59, %60, %cst_25 {dimension_numbers = #tpu.dot_dimension_numbers<[1], [1], [0], [0], [0, 0, 1, 0], [], []>} : vector<64x32xbf16>, vector<64x32xbf16>, vector<64x64xf32> -> vector<64x64xf32>
    %cst_26 = arith.constant dense<0xFF800000> : vector<64xf32>
    %63 = vector.multi_reduction <maximumf>, %62, %cst_26 [1] : vector<64x64xf32> to vector<64xf32>
    %64 = vector.shape_cast %63 : vector<64xf32> to vector<64x1xf32>
    %65 = vector.broadcast %64 : vector<64x1xf32> to vector<64x64xf32>
    %66 = arith.subf %62, %65 : vector<64x64xf32>
    %67 = math.exp %66 : vector<64x64xf32>
    %cst_27 = arith.constant dense<0.000000e+00> : vector<64xf32>
    %68 = vector.multi_reduction <add>, %67, %cst_27 [1] : vector<64x64xf32> to vector<64xf32>
    %69 = vector.shape_cast %68 : vector<64xf32> to vector<64x1xf32>
    %70 = vector.broadcast %69 : vector<64x1xf32> to vector<64x64xf32>
    %71 = arith.divf %67, %70 : vector<64x64xf32>
    %72 = arith.truncf %71 : vector<64x64xf32> to vector<64x64xbf16>
    %cst_28 = arith.constant dense<0.000000e+00> : vector<64x32xf32>
    %73 = tpu.matmul %72, %61, %cst_28 {dimension_numbers = #tpu.dot_dimension_numbers<[1], [0], [0], [1], [0, 0, 1, 1], [], []>} : vector<64x64xbf16>, vector<64x32xbf16>, vector<64x32xf32> -> vector<64x32xf32>
    %74 = vector.extract_strided_slice %28 {offsets = [0, 96], sizes = [64, 32], strides = [1, 1]} : vector<64x384xbf16> to vector<64x32xbf16>
    %75 = vector.extract_strided_slice %28 {offsets = [0, 224], sizes = [64, 32], strides = [1, 1]} : vector<64x384xbf16> to vector<64x32xbf16>
    %76 = vector.extract_strided_slice %28 {offsets = [0, 352], sizes = [64, 32], strides = [1, 1]} : vector<64x384xbf16> to vector<64x32xbf16>
    %cst_29 = arith.constant dense<0.000000e+00> : vector<64x64xf32>
    %77 = tpu.matmul %74, %75, %cst_29 {dimension_numbers = #tpu.dot_dimension_numbers<[1], [1], [0], [0], [0, 0, 1, 0], [], []>} : vector<64x32xbf16>, vector<64x32xbf16>, vector<64x64xf32> -> vector<64x64xf32>
    %cst_30 = arith.constant dense<0xFF800000> : vector<64xf32>
    %78 = vector.multi_reduction <maximumf>, %77, %cst_30 [1] : vector<64x64xf32> to vector<64xf32>
    %79 = vector.shape_cast %78 : vector<64xf32> to vector<64x1xf32>
    %80 = vector.broadcast %79 : vector<64x1xf32> to vector<64x64xf32>
    %81 = arith.subf %77, %80 : vector<64x64xf32>
    %82 = math.exp %81 : vector<64x64xf32>
    %cst_31 = arith.constant dense<0.000000e+00> : vector<64xf32>
    %83 = vector.multi_reduction <add>, %82, %cst_31 [1] : vector<64x64xf32> to vector<64xf32>
    %84 = vector.shape_cast %83 : vector<64xf32> to vector<64x1xf32>
    %85 = vector.broadcast %84 : vector<64x1xf32> to vector<64x64xf32>
    %86 = arith.divf %82, %85 : vector<64x64xf32>
    %87 = arith.truncf %86 : vector<64x64xf32> to vector<64x64xbf16>
    %cst_32 = arith.constant dense<0.000000e+00> : vector<64x32xf32>
    %88 = tpu.matmul %87, %76, %cst_32 {dimension_numbers = #tpu.dot_dimension_numbers<[1], [0], [0], [1], [0, 0, 1, 1], [], []>} : vector<64x64xbf16>, vector<64x32xbf16>, vector<64x32xf32> -> vector<64x32xf32>
    %89 = tpu.concatenate %43, %58, %73, %88 in 1 : vector<64x32xf32>, vector<64x32xf32>, vector<64x32xf32>, vector<64x32xf32> -> vector<64x128xf32>
    %90 = arith.truncf %89 : vector<64x128xf32> to vector<64x128xbf16>
    %c0_33 = arith.constant 0 : index
    %c0_34 = arith.constant 0 : index
    %91 = vector.load %arg7[%c0_33, %c0_34] : memref<128x32xbf16, #tpu.memory_space<vmem>>, vector<128x32xbf16>
    %cst_35 = arith.constant dense<0.000000e+00> : vector<64x32xf32>
    %92 = tpu.matmul %90, %91, %cst_35 {dimension_numbers = #tpu.dot_dimension_numbers<[1], [0], [0], [1], [0, 0, 1, 1], [], []>} : vector<64x128xbf16>, vector<128x32xbf16>, vector<64x32xf32> -> vector<64x32xf32>
    %c0_36 = arith.constant 0 : index
    %c0_37 = arith.constant 0 : index
    %93 = vector.load %arg8[%c0_36, %c0_37] : memref<1x32xf32, #tpu.memory_space<vmem>>, vector<1x32xf32>
    %94 = vector.broadcast %93 : vector<1x32xf32> to vector<64x32xf32>
    %95 = arith.addf %92, %94 : vector<64x32xf32>
    %96 = arith.addf %95, %1 : vector<64x32xf32>
    %c0_38 = arith.constant 0 : index
    %c0_39 = arith.constant 0 : index
    %c0_40 = arith.constant 0 : index
    %97 = vector.load %arg9[%c0_38, %c0_39, %c0_40] : memref<1x64x32xf32, #tpu.memory_space<vmem>>, vector<1x64x32xf32>
    %98 = vector.shape_cast %97 : vector<1x64x32xf32> to vector<64x32xf32>
    %99 = vector.shape_cast %96 : vector<64x32xf32> to vector<1x64x32xf32>
    tpu.vector_store %arg9[%c0_38, %c0_39, %c0_40], %99 {strides = array<i32>} : memref<1x64x32xf32, #tpu.memory_space<vmem>>, vector<1x64x32xf32>,
    return
  }
  func.func @transform_0(%arg0: i32) -> (i32, i32, i32) {
    %c0_i32 = arith.constant 0 : i32
    %c0_i32_0 = arith.constant 0 : i32
    %c0_i32_1 = arith.constant 0 : i32
    return %arg0, %c0_i32, %c0_i32_0 : i32, i32, i32
  }
  func.func @transform_1(%arg0: i32) -> (i32, i32) {
    %c0_i32 = arith.constant 0 : i32
    %c0_i32_0 = arith.constant 0 : i32
    %c0_i32_1 = arith.constant 0 : i32
    return %c0_i32, %c0_i32_0 : i32, i32
  }
  func.func @transform_2(%arg0: i32) -> (i32, i32) {
    %c0_i32 = arith.constant 0 : i32
    %c0_i32_0 = arith.constant 0 : i32
    %c0_i32_1 = arith.constant 0 : i32
    return %c0_i32, %c0_i32_0 : i32, i32
  }
  func.func @transform_3(%arg0: i32) -> (i32, i32) {
    %c0_i32 = arith.constant 0 : i32
    %c0_i32_0 = arith.constant 0 : i32
    %c0_i32_1 = arith.constant 0 : i32
    return %c0_i32, %c0_i32_0 : i32, i32
  }
  func.func @transform_4(%arg0: i32) -> (i32, i32) {
    %c0_i32 = arith.constant 0 : i32
    %c0_i32_0 = arith.constant 0 : i32
    %c0_i32_1 = arith.constant 0 : i32
    return %c0_i32, %c0_i32_0 : i32, i32
  }
  func.func @transform_5(%arg0: i32) -> (i32, i32) {
    %c0_i32 = arith.constant 0 : i32
    %c0_i32_0 = arith.constant 0 : i32
    %c0_i32_1 = arith.constant 0 : i32
    return %c0_i32, %c0_i32_0 : i32, i32
  }
  func.func @transform_6(%arg0: i32) -> (i32, i32) {
    %c0_i32 = arith.constant 0 : i32
    %c0_i32_0 = arith.constant 0 : i32
    %c0_i32_1 = arith.constant 0 : i32
    return %c0_i32, %c0_i32_0 : i32, i32
  }
  func.func @transform_7(%arg0: i32) -> (i32, i32) {
    %c0_i32 = arith.constant 0 : i32
    %c0_i32_0 = arith.constant 0 : i32
    %c0_i32_1 = arith.constant 0 : i32
    return %c0_i32, %c0_i32_0 : i32, i32
  }
  func.func @transform_8(%arg0: i32) -> (i32, i32, i32) {
    %c0_i32 = arith.constant 0 : i32
    %c0_i32_0 = arith.constant 0 : i32
    %c0_i32_1 = arith.constant 0 : i32
    return %arg0, %c0_i32, %c0_i32_0 : i32, i32, i32
  }
}

</mosaic_0001>

<bundles_post_ra>
// kernel: mha_block_forward.1
= control target key start
LH: loop header
LB: loop body
LE: loop exit
PB: predicated region body
PF: predicated region fallthrough
CT: control target
= control target key end

     0   :  { %13 = vsyncpa [#allocation3], 0  ;;  %s3900_s0 = inlined_call_operand.vmem [shape: f32[2,64,32], index: 0, kind: input, shape index: {}]   ;;  %s3901_s1 = inlined_call_operand.vmem [shape: f32[32,32], index: 1, kind: input, shape index: {}]   ;;  %s3902_s2 = inlined_call_operand.vmem [shape: f32[1,32], index: 2, kind: input, shape index: {}]   ;;  %s3903_s3 = inlined_call_operand.vmem [shape: f32[1,32], index: 3, kind: input, shape index: {}]   ;;  %s3904_s4 = inlined_call_operand.vmem [shape: bf16[32,384], index: 4, kind: input, shape index: {}]   ;;  %s3905_s5 = inlined_call_operand.vmem [shape: f32[1,384], index: 5, kind: input, shape index: {}]   ;;  %s3906_s6 = inlined_call_operand.vmem [shape: bf16[128,32], index: 6, kind: input, shape index: {}]   ;;  %s3907_s7 = inlined_call_operand.vmem [shape: f32[1,32], index: 7, kind: input, shape index: {}]   ;;  %s3908_s8 = inlined_call_operand.hbm [shape: f32[2,64,32], index: 8, kind: output, shape index: {}]  }
   0x1   :  { %15 = vsyncpa [#allocation3 + $0x1], 0  ;;  %s3022_s27 = smov 0   ;;  %s3024_s28 = smov 0  }
   0x2   :  { %s3026_s29 = smov 0   ;;  %s3028_s30 = smov 0  }
   0x3 LB: > { %s3043_s9 = sadd.s32 4294967295, %s2965_s30   ;;  %s2263_s10 = sadd.s32 4294967294, %s2965_s30   ;;  %s2965_s30 = sphi %s3028_s30, %s3914_s30   ;;  %s2961_s29 = sphi %s3026_s29, %s3913_s29   ;;  %s2957_s28 = sphi %s3024_s28, %s3912_s28   ;;  %s2953_s27 = sphi %s3022_s27, %s3911_s27  }
   0x4   : > { %s3047_s11 = sadd.s32 1, %s2965_s30   ;;  %s201_s12 = sadd.s32 1, %s2961_s29 }
   0x5   : > { %s198_s13 = ssub.s32 %s2965_s30, %s3047_s11  ;;  %p211_p0 = scmp.ne.s32.totalorder %s2961_s29, %s2957_s28 }
   0x6   : > { %p199_p1 = scmp.eq.s32.totalorder %s198_s13, 0  ;;  %p212_p2 = scmp.eq.s32.totalorder %s3043_s9, 1 }
   0x7   : > { %p217_p3 = scmp.ne.s32.totalorder %s2957_s28, %s2953_s27  ;;  %p218_p4 = scmp.eq.s32.totalorder %s2263_s10, 1 }
   0x8   : > { %s3058_s14 = scalar_select %p199_p1, %s2961_s29, %s201_s12  }
   0x9   : > { %p3060_p5 = por %p212_p2, %p211_p0  ;;  %p3064_p6 = por %p218_p4, %p217_p3 }
   0xa   : > { %p2266_p7 = scmp.ge.s32.totalorder %s2965_s30, 1  ;;  %p265_p8 = scmp.lt.s32.totalorder %s2965_s30, 3 }
   0xc   : > { %p266_p9 = pnand %p2266_p7, %p265_p8 }
   0xd   : > { %v313_v0 = vld [vmem:[%s3901_s1] sm:$0xff] (!%p266_p9)  ;;  %v314_v1 = vld [vmem:[%s3901_s1 + $0x8] sm:$0xff] (!%p266_p9)  ;;  %v315_v2 = vld [vmem:[%s3901_s1 + $0x10] sm:$0xff] (!%p266_p9)  ;;  %v2967_v3 = vmov (!%p266_p9), 0.0|0.0   ;;  %vm2968_vm0 = vmmov (!%p266_p9), 0   ;;  %v2969_v6 = vmov (!%p266_p9), 0.0   ;;  %v412_v37 = vlaneseq (!%p266_p9) }
   0xe   : > { %269 = sbr.rel (%p266_p9) target bundleno = 3375 (0xd2f), region = 52  ;;  %2613 = vmatprep.subr.bf16.mxu0 (!%p266_p9), %v2967_v3  ;;  %v2614_v4 = vpack.c.bf16 (!%p266_p9), %v314_v1, %v313_v0  ;;  %v316_v5 = vld [vmem:[%s3901_s1 + $0x18] sm:$0xff] (!%p266_p9)  ;;  %2435 = vmatprep.mubr.msk.f32.mxu0 (!%p266_p9), %vm2968_vm0, %v2969_v6  ;;  %p299_p10 = scmp.lt.s32.totalorder (!%p266_p9), %s3043_s9, 1  ;;  %vm317_vm1 = vcmask (!%p266_p9), 261120   ;;  %vm870_vm2 = vcmask (!%p266_p9), 523264   ;;  %vm2022_vm3 = vcmask (!%p266_p9), 785408  }
   0xf   : > { %2619 = vmatprep.subr.bf16.mxu1 (!%p266_p9), %v2967_v3  ;;  %2446 = vmatprep.mubr.msk.f32.mxu1 (!%p266_p9), %vm2968_vm0, %v2969_v6  ;;  %v2617_v7 = vpack.c.bf16 (!%p266_p9), %v316_v5, %v315_v2  ;;  %v3106_v38 = vshrl.u32 (!%p266_p9), %v412_v37, 7  ;;  %s2971_s23 = smov (!%p266_p9), 96   ;;  %s2972_s24 = smov (!%p266_p9), 64  }
  0x10   : > { %2615 = vmatpush3.bf16.msra.mxu0 (!%p266_p9), %v2614_v4  ;;  %2621 = vmatpush3.bf16.msra.mxu1 (!%p266_p9), %v2614_v4  ;;  %s2974_s19 = smov (!%p266_p9), [#allocation2]  }
  0x11   : > { %2616 = vmatprep.subr.bf16.mxu0 (!%p266_p9), %v2967_v3  ;;  %2622 = vmatprep.subr.bf16.mxu1 (!%p266_p9), %v2967_v3  ;;  %v3109_v39 = vsub.s32 (!%p266_p9), 0, %v3106_v38 }
  0x14   : > { %2618 = vmatpush3.bf16.msra.mxu0 (!%p266_p9), %v2617_v7  ;;  %2624 = vmatpush3.bf16.msra.mxu1 (!%p266_p9), %v2617_v7 }
  0x15   : > { %s300_s25 = scalar_select %p299_p10, %s3043_s9, 1 }
  0x17   : > { %s2333_s26 = sshll.u32 %s300_s25, 6  ;;  %s2973_s25 = smov 32  }
  0x18   : > { %s3087_s13 = scalar_lea.vmem %s3900_s0, %s2333_s26 }
  0x19   : > { %v305_v8 = vld [vmem:[%s3087_s13] sm:$0xff]  ;;  %v306_v9 = vld [vmem:[%s3087_s13 + $0x8] sm:$0xff]  ;;  %v307_v10 = vld [vmem:[%s3087_s13 + $0x10] sm:$0xff] }
  0x1a   : > { %v308_v11 = vld [vmem:[%s3087_s13 + $0x18] sm:$0xff]  ;;  %v309_v12 = vld [vmem:[%s3087_s13 + $0x20] sm:$0xff]  ;;  %v318_v13 = vsel %vm317_vm1, %v305_v8, 0.0  ;;  %v319_v14 = vsel %vm317_vm1, %v306_v9, 0.0  ;;  %v321_v15 = vsel %vm317_vm1, %v307_v10, 0.0  ;;  %v310_v16 = vld [vmem:[%s3087_s13 + $0x28] sm:$0xff] }
  0x1b   : > { %v320_v17 = vadd.f32 %v319_v14, %v318_v13  ;;  %v323_v18 = vsel %vm317_vm1, %v308_v11, 0.0  ;;  %v325_v19 = vsel %vm317_vm1, %v309_v12, 0.0  ;;  %v311_v21 = vld [vmem:[%s3087_s13 + $0x30] sm:$0xff]  ;;  %v327_v23 = vsel %vm317_vm1, %v310_v16, 0.0  ;;  %v312_v24 = vld [vmem:[%s3087_s13 + $0x38] sm:$0xff] }
  0x1c   : > { %v329_v26 = vsel %vm317_vm1, %v311_v21, 0.0  ;;  %v331_v28 = vsel %vm317_vm1, %v312_v24, 0.0 }
  0x1d   : > { %v322_v20 = vadd.f32 %v321_v15, %v320_v17  ;;  %v2751_v17 = vld [vmem:[%s3904_s4 + $0x4] ss:$12 sps:$4 sm:$0xff]  }
  0x1e   : > { %631 = vmatprep.subr.bf16.mxu0 %v2751_v17 }
  0x1f   : > { %v324_v22 = vadd.f32 %v323_v18, %v322_v20  ;;  %v2752_v18 = vld [vmem:[%s3904_s4 + $0x8] ss:$12 sps:$4 sm:$0xff]   ;;  %v2756_v20 = vld [vmem:[%s3904_s4 + $0x20] ss:$12 sps:$4 sm:$0xff]  }
  0x20   : > { %2449 = vmatprep.subr.bf16.mxu1 %v2752_v18 }
  0x21   : > { %v326_v25 = vadd.f32 %v325_v19, %v324_v22  ;;  %v2755_v19 = vld [vmem:[%s3904_s4 + $0x1c] ss:$12 sps:$4 sm:$0xff]   ;;  %v2970_v22 = vmov 0  }
  0x23   : > { %v328_v27 = vadd.f32 %v327_v23, %v326_v25 }
  0x25   : > { %v330_v29 = vadd.f32 %v329_v26, %v328_v27  ;;  %v527_v26 = vld [vmem:[%s3902_s2] sm:$0x1] }
  0x27   : > { %v332_v30 = vadd.f32 %v331_v28, %v330_v29 }
  0x29   : > { %v333_v31 = vrot.slane %v332_v30, 4 }
  0x2b   : > { %v334_v32 = vadd.f32 %v333_v31, %v332_v30  ;;  %v2272_v30 = vld [vmem:[%s3903_s3] ss:$0 sm:$0xff] }
  0x2d   : > { %v335_v33 = vrot.slane %v334_v32, 2 }
  0x2f   : > { %v336_v34 = vadd.f32 %v335_v33, %v334_v32 }
  0x31   : > { %v337_v35 = vrot.slane %v336_v34, 1 }
  0x33   : > { %v338_v36 = vadd.f32 %v337_v35, %v336_v34 }
  0x35   : > { %2436 = vmatmul.mubr.msk.f32.vlgmr.msra.gmra.mrb[0].mxu0 %vm317_vm1, %v338_v36 }
  0x36   : > { %663 = vmatprep.mubr.bf16.mxu0 %v2970_v22 }
 0x108   : > { %v408_v40 = vpop.f32.mrb[0].mxu0 }
 0x109   : > { %v415_v41 = vrot.slane %v408_v40, %v3109_v39  ;;  %v2437_v42 = vpop.f32.mrb[1].mxu0 }
 0x10b   : > { %v3112_v43 = vsub.f32 %v305_v8, %v415_v41  ;;  %v3114_v44 = vsub.f32 %v306_v9, %v415_v41  ;;  %v3116_v45 = vsub.f32 %v307_v10, %v415_v41  ;;  %v3118_v46 = vsub.f32 %v308_v11, %v415_v41 }
 0x10c   : > { %v3120_v47 = vsub.f32 %v309_v12, %v415_v41  ;;  %v421_v51 = vsub.f32 %v310_v16, %v415_v41  ;;  %v3132_v56 = vsub.f32 %v311_v21, %v415_v41  ;;  %v423_v60 = vsub.f32 %v312_v24, %v415_v41  ;;  %v2749_v16 = vld [vmem:[%s3904_s4] ss:$12 sps:$4 sm:$0xff]   ;;  %v2753_v21 = vld [vmem:[%s3904_s4 + $0x18] ss:$12 sps:$4 sm:$0xff]  }
 0x10d   : > { %v424_v48 = vmul.f32 %v3112_v43, %v3112_v43  ;;  %v425_v49 = vmul.f32 %v3114_v44, %v3114_v44  ;;  %v426_v50 = vmul.f32 %v3116_v45, %v3116_v45  ;;  %v427_v52 = vmul.f32 %v3118_v46, %v3118_v46  ;;  %632 = vmatpush1.bf16.msra.mxu0 %v2749_v16 }
 0x10e   : > { %v428_v57 = vmul.f32 %v3120_v47, %v3120_v47  ;;  %v429_v61 = vmul.f32 %v421_v51, %v421_v51  ;;  %v430_v0 = vmul.f32 %v3132_v56, %v3132_v56  ;;  %v431_v3 = vmul.f32 %v423_v60, %v423_v60  ;;  %633 = vmatprep.subr.bf16.mxu0 %v2755_v19 }
 0x10f   : > { %v432_v53 = vsel %vm317_vm1, %v424_v48, 0.0  ;;  %v433_v54 = vsel %vm317_vm1, %v425_v49, 0.0  ;;  %v435_v58 = vsel %vm317_vm1, %v426_v50, 0.0  ;;  %v437_v62 = vsel %vm317_vm1, %v427_v52, 0.0 }
 0x110   : > { %v434_v55 = vadd.f32 %v433_v54, %v432_v53  ;;  %v439_v1 = vsel %vm317_vm1, %v428_v57, 0.0  ;;  %v441_v4 = vsel %vm317_vm1, %v429_v61, 0.0  ;;  %v443_v6 = vsel %vm317_vm1, %v430_v0, 0.0 }
 0x111   : > { %v445_v8 = vsel %vm317_vm1, %v431_v3, 0.0  ;;  %634 = vmatpush1.bf16.msra.mxu0 %v2753_v21  ;;  %v582_v54 = vsub.s32 2, %v3106_v38 }
 0x112   : > { %v436_v59 = vadd.f32 %v435_v58, %v434_v55  ;;  %v570_v55 = vld [vmem:[%s3905_s5] sm:$0x7] }
 0x113   : > { %v583_v57 = vrot.slane %v570_v55, %v582_v54  ;;  %v3192_v58 = vrot.slane %v570_v55, %v3109_v39 }
 0x114   : > { %v438_v63 = vadd.f32 %v437_v62, %v436_v59 }
 0x116   : > { %v440_v2 = vadd.f32 %v439_v1, %v438_v63 }
 0x118   : > { %v442_v5 = vadd.f32 %v441_v4, %v440_v2 }
 0x11a   : > { %v444_v7 = vadd.f32 %v443_v6, %v442_v5 }
 0x11c   : > { %v446_v9 = vadd.f32 %v445_v8, %v444_v7 }
 0x11e   : > { %v447_v10 = vrot.slane %v446_v9, 4 }
 0x120   : > { %v448_v11 = vadd.f32 %v447_v10, %v446_v9 }
 0x122   : > { %v449_v12 = vrot.slane %v448_v11, 2 }
 0x124   : > { %v450_v13 = vadd.f32 %v449_v12, %v448_v11 }
 0x126   : > { %v451_v14 = vrot.slane %v450_v13, 1 }
 0x128   : > { %v452_v15 = vadd.f32 %v451_v14, %v450_v13 }
 0x12a   : > { %2447 = vmatmul.mubr.msk.f32.vlgmr.msra.gmra.mrb[0].mxu1 %vm317_vm1, %v452_v15 }
 0x12b   : > { %2450 = vmatpush3.bf16.msra.mxu1 %v2752_v18 }
 0x12c   : > { %2451 = vmatprep.subr.bf16.mxu1 %v2756_v20 }
 0x12f   : > { %2452 = vmatpush3.bf16.msra.mxu1 %v2756_v20 }
 0x1fd   : > { %v522_v23 = vpop.f32.mrb[0].mxu1 }
 0x1fe   : > { %v523_v24 = vadd.f32 1e-05, %v522_v23  ;;  %v2448_v25 = vpop.f32.mrb[1].mxu1 }
 0x200   : > { %2765 = vrsqrt.f32 %v523_v24 }
 0x20a   : > { %v2766_v27 = vpop.eup %2765 }
 0x20b   : > { %v528_v28 = vmul.f32 %v2766_v27, %v527_v26 }
 0x20d   : > { %v533_v29 = vrot.slane %v528_v28, %v3109_v39 }
 0x20f   : > { %v535_v31 = vmul.f32 %v533_v29, %v3112_v43  ;;  %v536_v32 = vmul.f32 %v533_v29, %v3114_v44  ;;  %v537_v33 = vmul.f32 %v533_v29, %v3116_v45  ;;  %v538_v34 = vmul.f32 %v533_v29, %v3118_v46 }
 0x210   : > { %v539_v35 = vmul.f32 %v533_v29, %v3120_v47  ;;  %v540_v36 = vmul.f32 %v533_v29, %v421_v51  ;;  %v541_v53 = vmul.f32 %v533_v29, %v3132_v56  ;;  %v542_v43 = vmul.f32 %v533_v29, %v423_v60 }
 0x211   : > { %v550_v37 = vadd.f32 %v2272_v30, %v535_v31  ;;  %v551_v40 = vadd.f32 %v2272_v30, %v536_v32  ;;  %v552_v41 = vadd.f32 %v2272_v30, %v537_v33  ;;  %v553_v42 = vadd.f32 %v2272_v30, %v538_v34 }
 0x212   : > { %v554_v48 = vadd.f32 %v2272_v30, %v539_v35  ;;  %v555_v49 = vadd.f32 %v2272_v30, %v540_v36  ;;  %v556_v45 = vadd.f32 %v2272_v30, %v541_v53  ;;  %v557_v46 = vadd.f32 %v2272_v30, %v542_v43 }
 0x213   : > { %v558_v50 = vpack.c.bf16 %v551_v40, %v550_v37  ;;  %v559_v52 = vpack.c.bf16 %v553_v42, %v552_v41  ;;  %v578_v51 = vsub.s32 1, %v3106_v38 }
 0x214   : > { %v560_v44 = vpack.c.bf16 %v555_v49, %v554_v48  ;;  %v561_v47 = vpack.c.bf16 %v557_v46, %v556_v45 }
 0x215   : > { %2279 = vmatmul.mubr.msk.bf16.vlgmr.msra.gmra.mrb[4].mxu0 %vm317_vm1, %v558_v50  ;;  %2453 = vmatprep.mubr.msk.bf16.mxu1 %vm317_vm1, %v558_v50  ;;  %v3189_v56 = vrot.slane %v570_v55, %v578_v51 }
 0x216   : > { %2454 = vmatmul.mubr.msk.bf16.vlgmr.msra.gmra.mrb[4].mxu1 %vm317_vm1, %v559_v52  ;;  %673 = vmatprep.mubr.bf16.mxu0 %v2970_v22 }
 0x217   : > { %2457 = vmatprep.mubr.msk.bf16.mxu1 %vm317_vm1, %v560_v44 }
 0x21d   : > { %2280 = vmatmul.mubr.msk.bf16.gmra.mrb[8].mxu0 %vm317_vm1, %v559_v52 }
 0x21e   : > { %2458 = vmatmul.mubr.msk.bf16.gmra.mrb[8].mxu1 %vm317_vm1, %v561_v47  ;;  %683 = vmatprep.mubr.bf16.mxu0 %v2970_v22 }
 0x225   : > { %2281 = vmatmul.mubr.msk.bf16.gmra.mrb[12].mxu0 %vm317_vm1, %v560_v44 }
 0x226   : > { %693 = vmatprep.mubr.bf16.mxu0 %v2970_v22 }
 0x22d   : > { %2282 = vmatmul.mubr.msk.bf16.gmra.mrb[16].mxu0 %vm317_vm1, %v561_v47 }
 0x2e8   : > { %v665_v59 = vpop.f32.mrb[4].mxu0 }
 0x2e9   : > { %v667_v60 = vpop.f32.mrb[5].mxu0  ;;  %v2455_v61 = vpop.f32.mrb[4].mxu1  ;;  %v666_v38 = vadd.f32 %v665_v59, %v3192_v58 }
 0x2ea   : > { %v668_v62 = vadd.f32 %v667_v60, %v3189_v56  ;;  %v747_v63 = vadd.f32 %v2455_v61, %v583_v57  ;;  %v669_v0 = vpop.f32.mrb[6].mxu0  ;;  %v738_v1 = vpop.f32.mrb[5].mxu1 }
 0x2eb   : > { %v670_v2 = vadd.f32 %v669_v0, %v3192_v58  ;;  %v739_v3 = vadd.f32 %v738_v1, %v583_v57  ;;  %v671_v4 = vpop.f32.mrb[7].mxu0  ;;  %v2456_v5 = vpop.f32.mrb[6].mxu1 }
 0x2ec   : > { %v672_v6 = vadd.f32 %v671_v4, %v3189_v56  ;;  %v750_v7 = vadd.f32 %v2456_v5, %v583_v57  ;;  %v741_v39 = vpop.f32.mrb[7].mxu1 }
 0x2ed   : > { %v3198_v8 = vpack.c.bf16 %v670_v2, %v666_v38  ;;  %v742_v9 = vadd.f32 %v741_v39, %v583_v57 }
 0x2ee   : > { %v3200_v10 = vpack.c.bf16 %v672_v6, %v668_v62  ;;  %v3202_v11 = vpack.c.bf16 %v750_v7, %v747_v63 }
 0x2ef   : > { %v3204_v12 = vpack.c.bf16 %v742_v9, %v739_v3  ;;  %2469 = vmatprep.mubr.msk.bf16.mxu0 %vm317_vm1, %v3198_v8 }
 0x2f0   : > { %v675_v13 = vpop.f32.mrb[8].mxu0  ;;  %2625 = vmatprep.subr.msk.bf16.mxu0 %vm317_vm1, %v3200_v10  ;;  %v794_v14 = vsel %vm317_vm1, %v3200_v10, 0 }
 0x2f1   : > { %v677_v15 = vpop.f32.mrb[9].mxu0  ;;  %v2459_v16 = vpop.f32.mrb[8].mxu1  ;;  %2462 = vmatpush3.bf16.xpose.msra.mxu0 %v794_v14  ;;  %2477 = vmatprep.subr.bf16.mxu1 %v3204_v12  ;;  %v676_v21 = vadd.f32 %v675_v13, %v3192_v58 }
 0x2f2   : > { %v678_v17 = vadd.f32 %v677_v15, %v3189_v56  ;;  %v763_v18 = vadd.f32 %v2459_v16, %v583_v57  ;;  %v679_v19 = vpop.f32.mrb[10].mxu0  ;;  %v754_v20 = vpop.f32.mrb[9].mxu1  ;;  %2478 = vmatpush3.bf16.msra.mxu1 %v3204_v12 }
 0x2f3   : > { %v680_v22 = vadd.f32 %v679_v19, %v3192_v58  ;;  %v755_v23 = vadd.f32 %v754_v20, %v583_v57  ;;  %v681_v24 = vpop.f32.mrb[11].mxu0  ;;  %v2460_v25 = vpop.f32.mrb[10].mxu1  ;;  %2479 = vmatprep.subr.bf16.mxu1 %v3202_v11 }
 0x2f4   : > { %v682_v26 = vadd.f32 %v681_v24, %v3189_v56  ;;  %v766_v27 = vadd.f32 %v2460_v25, %v583_v57  ;;  %v757_v28 = vpop.f32.mrb[11].mxu1 }
 0x2f5   : > { %v3219_v29 = vpack.c.bf16 %v680_v22, %v676_v21  ;;  %v758_v30 = vadd.f32 %v757_v28, %v583_v57 }
 0x2f6   : > { %v3221_v31 = vpack.c.bf16 %v682_v26, %v678_v17  ;;  %v3223_v32 = vpack.c.bf16 %v766_v27, %v763_v18  ;;  %2480 = vmatpush3.bf16.msra.mxu1 %v3202_v11 }
 0x2f7   : > { %v3226_v33 = vpack.c.bf16 %v758_v30, %v755_v23 }
 0x2f8   : > { %v685_v34 = vpop.f32.mrb[12].mxu0  ;;  %2626 = vmatprep.subr.msk.bf16.mxu0 %vm317_vm1, %v3221_v31  ;;  %v797_v35 = vsel %vm317_vm1, %v3221_v31, 0 }
 0x2f9   : > { %v687_v36 = vpop.f32.mrb[13].mxu0  ;;  %2464 = vmatpush3.bf16.xpose.msra.mxu0 %v797_v35  ;;  %2481 = vmatprep.subr.bf16.mxu1 %v3226_v33  ;;  %v686_v41 = vadd.f32 %v685_v34, %v3192_v58 }
 0x2fa   : > { %v688_v37 = vadd.f32 %v687_v36, %v3189_v56  ;;  %v689_v40 = vpop.f32.mrb[14].mxu0  ;;  %2482 = vmatpush3.bf16.msra.mxu1 %v3226_v33 }
 0x2fb   : > { %v690_v42 = vadd.f32 %v689_v40, %v3192_v58  ;;  %v691_v48 = vpop.f32.mrb[15].mxu0  ;;  %2483 = vmatprep.subr.bf16.mxu1 %v3223_v32 }
 0x2fc   : > { %v692_v49 = vadd.f32 %v691_v48, %v3189_v56 }
 0x2fd   : > { %v3239_v50 = vpack.c.bf16 %v690_v42, %v686_v41 }
 0x2fe   : > { %v3241_v52 = vpack.c.bf16 %v692_v49, %v688_v37  ;;  %2484 = vmatpush3.bf16.msra.mxu1 %v3223_v32 }
 0x300   : > { %v695_v53 = vpop.f32.mrb[16].mxu0  ;;  %2627 = vmatprep.subr.msk.bf16.mxu0 %vm317_vm1, %v3241_v52  ;;  %v800_v43 = vsel %vm317_vm1, %v3241_v52, 0 }
 0x301   : > { %v697_v44 = vpop.f32.mrb[17].mxu0  ;;  %2466 = vmatpush3.bf16.xpose.msra.mxu0 %v800_v43  ;;  %v696_v47 = vadd.f32 %v695_v53, %v3192_v58 }
 0x302   : > { %v698_v45 = vadd.f32 %v697_v44, %v3189_v56  ;;  %v699_v46 = vpop.f32.mrb[18].mxu0 }
 0x303   : > { %v700_v51 = vadd.f32 %v699_v46, %v3192_v58  ;;  %v701_v54 = vpop.f32.mrb[19].mxu0 }
 0x304   : > { %v702_v55 = vadd.f32 %v701_v54, %v3189_v56 }
 0x305   : > { %v3252_v57 = vpack.c.bf16 %v700_v51, %v696_v47 }
 0x306   : > { %v3254_v59 = vpack.c.bf16 %v702_v55, %v698_v45 }
 0x308   : > { %2628 = vmatprep.subr.msk.bf16.mxu0 %vm317_vm1, %v3254_v59  ;;  %v803_v60 = vsel %vm317_vm1, %v3254_v59, 0 }
 0x309   : > { %2468 = vmatpush3.bf16.xpose.msra.mxu0 %v803_v60 }
 0x310   : > { %2470 = vmatmul.mubr.msk.bf16.vlgmr.msra.gmra.mrb[20].mxu0 %vm317_vm1, %v3219_v29 }
 0x311   : > { %2473 = vmatprep.mubr.msk.bf16.mxu0 %vm317_vm1, %v3239_v50 }
 0x318   : > { %2474 = vmatmul.mubr.msk.bf16.gmra.mrb[24].mxu0 %vm317_vm1, %v3252_v57 }
 0x3e3   : > { %v2471_v56 = vpop.f32.mrb[20].mxu0 }
 0x3e4   : > { %v839_v58 = vpop.f32.mrb[21].mxu0  ;;  %v877_v61 = vsel %vm870_vm2, %v2471_v56, -inf }
 0x3e5   : > { %878 = vmax.xlane.f32.xlu1 %v877_v61  ;;  %v2472_v62 = vpop.f32.mrb[22].mxu0  ;;  %v871_v63 = vsel %vm870_vm2, %v839_v58, -inf }
 0x3e6   : > { %872 = vmax.xlane.f32.xlu0 %v871_v63  ;;  %v842_v0 = vpop.f32.mrb[23].mxu0  ;;  %v880_v1 = vsel %vm870_vm2, %v2472_v62, -inf }
 0x3e7   : > { %v874_v38 = vsel %vm870_vm2, %v842_v0, -inf }
 0x3e9   : > { %881 = vmax.xlane.f32.xlu1 %v880_v1 }
 0x3ea   : > { %875 = vmax.xlane.f32.xlu0 %v874_v38 }
 0x3eb   : > { %v2475_v2 = vpop.f32.mrb[24].mxu0 }
 0x3ec   : > { %v855_v3 = vpop.f32.mrb[25].mxu0  ;;  %v889_v39 = vsel %vm870_vm2, %v2475_v2, -inf }
 0x3ed   : > { %v2476_v4 = vpop.f32.mrb[26].mxu0  ;;  %v883_v5 = vsel %vm870_vm2, %v855_v3, -inf }
 0x3ee   : > { %884 = vmax.xlane.f32.xlu0 %v883_v5  ;;  %v858_v6 = vpop.f32.mrb[27].mxu0  ;;  %v892_v7 = vsel %vm870_vm2, %v2476_v4, -inf }
 0x3ef   : > { %893 = vmax.xlane.f32.xlu1 %v892_v7  ;;  %v886_v9 = vsel %vm870_vm2, %v858_v6, -inf }
 0x3f2   : > { %890 = vmax.xlane.f32.xlu0 %v889_v39 }
 0x3f3   : > { %887 = vmax.xlane.f32.xlu1 %v886_v9 }
 0x404   : > { %1058 = vrot.lane.b32.xlu1 %v3221_v31, %s2971_s23 }
 0x408   : > { %1060 = vrot.lane.b32.xlu1 %v3241_v52, %s2971_s23 }
 0x472   : > { %v879_v13 = vpop.xlane.xlu1 %878 }
 0x473   : > { %v897_v14 = vsub.f32 %v2471_v56, %v879_v13  ;;  %v873_v15 = vpop.xlane.xlu0 %872 }
 0x474   : > { %v895_v16 = vsub.f32 %v839_v58, %v873_v15 }
 0x475   : > { %v907_v17 = vmul.f32 1.442695, %v897_v14 }
 0x476   : > { %v903_v18 = vmul.f32 1.442695, %v895_v16  ;;  %v882_v19 = vpop.xlane.xlu1 %881 }
 0x477   : > { %2767 = vpow2.f32 %v907_v17  ;;  %v898_v20 = vsub.f32 %v2472_v62, %v882_v19  ;;  %v876_v21 = vpop.xlane.xlu0 %875 }
 0x478   : > { %v896_v22 = vsub.f32 %v842_v0, %v876_v21  ;;  %2769 = vpow2.f32 %v903_v18 }
 0x479   : > { %v909_v23 = vmul.f32 1.442695, %v898_v20 }
 0x47a   : > { %v905_v24 = vmul.f32 1.442695, %v896_v22 }
 0x47b   : > { %2771 = vpow2.f32 %v909_v23  ;;  %v885_v37 = vpop.xlane.xlu0 %884 }
 0x47c   : > { %2773 = vpow2.f32 %v905_v24  ;;  %v894_v41 = vpop.xlane.xlu1 %893  ;;  %v899_v48 = vsub.f32 %v855_v3, %v885_v37 }
 0x47d   : > { %v902_v49 = vsub.f32 %v2476_v4, %v894_v41 }
 0x47e   : > { %v911_v44 = vmul.f32 1.442695, %v899_v48 }
 0x47f   : > { %v891_v40 = vpop.xlane.xlu0 %890  ;;  %v917_v45 = vmul.f32 1.442695, %v902_v49 }
 0x480   : > { %v901_v42 = vsub.f32 %v2475_v2, %v891_v40  ;;  %v888_v43 = vpop.xlane.xlu1 %887 }
 0x481   : > { %v3278_v25 = vpop.eup %2767  ;;  %v900_v46 = vsub.f32 %v858_v6, %v888_v43 }
 0x482   : > { %v925_v26 = vsel %vm870_vm2, %v3278_v25, 0.0  ;;  %v3282_v27 = vpop.eup %2769  ;;  %v915_v53 = vmul.f32 1.442695, %v901_v42 }
 0x483   : > { %926 = vadd.xlane.f32.xlu0 %v925_v26  ;;  %v919_v30 = vsel %vm870_vm2, %v3282_v27, 0.0  ;;  %v913_v47 = vmul.f32 1.442695, %v900_v46 }
 0x484   : > { %2775 = vpow2.f32 %v915_v53  ;;  %v1059_v63 = vpop.permute.xlu1 %1058 }
 0x485   : > { %v3284_v28 = vpop.eup %2771  ;;  %2777 = vpow2.f32 %v911_v44  ;;  %v1080_v21 = vsel %vm317_vm1, %v1059_v63, 0 }
 0x486   : > { %v928_v34 = vsel %vm870_vm2, %v3284_v28, 0.0  ;;  %v3290_v35 = vpop.eup %2773  ;;  %2779 = vpow2.f32 %v917_v45 }
 0x487   : > { %920 = vadd.xlane.f32.xlu0 %v919_v30  ;;  %929 = vadd.xlane.f32.xlu1 %v928_v34  ;;  %v922_v36 = vsel %vm870_vm2, %v3290_v35, 0.0  ;;  %2781 = vpow2.f32 %v913_v47 }
 0x488   : > { %v1061_v0 = vpop.permute.xlu1 %1060 }
 0x489   : > { %v1083_v22 = vsel %vm317_vm1, %v1061_v0, 0 }
 0x48b   : > { %923 = vadd.xlane.f32.xlu1 %v922_v36 }
 0x48e   : > { %v3298_v51 = vpop.eup %2775 }
 0x48f   : > { %v3300_v54 = vpop.eup %2777  ;;  %v937_v55 = vsel %vm870_vm2, %v3298_v51, 0.0 }
 0x490   : > { %v3304_v60 = vpop.eup %2779  ;;  %v931_v56 = vsel %vm870_vm2, %v3300_v54, 0.0 }
 0x491   : > { %v940_v58 = vsel %vm870_vm2, %v3304_v60, 0.0  ;;  %v3310_v61 = vpop.eup %2781 }
 0x492   : > { %v934_v62 = vsel %vm870_vm2, %v3310_v61, 0.0 }
 0x49c   : > { %1346 = vrot.lane.b32.xlu1 %v3200_v10, %s2972_s24 }
 0x49d   : > { %1056 = vrot.lane.b32.xlu0 %v3200_v10, %s2971_s23 }
 0x4bc   : > { %938 = vadd.xlane.f32.xlu0 %v937_v55 }
 0x4c0   : > { %932 = vadd.xlane.f32.xlu0 %v931_v56  ;;  %941 = vadd.xlane.f32.xlu1 %v940_v58 }
 0x4c4   : > { %935 = vadd.xlane.f32.xlu1 %v934_v62 }
 0x4d5   : > { %1348 = vrot.lane.b32.xlu1 %v3221_v31, %s2972_s24 }
 0x4d6   : > { %1062 = vrot.lane.b32.xlu0 %v3254_v59, %s2971_s23 }
 0x4d9   : > { %1046 = vrot.lane.b32.xlu1 %v3219_v29, %s2971_s23 }
 0x4da   : > { %1044 = vrot.lane.b32.xlu0 %v3198_v8, %s2971_s23 }
 0x4dd   : > { %1048 = vrot.lane.b32.xlu1 %v3239_v50, %s2971_s23 }
 0x4de   : > { %1350 = vrot.lane.b32.xlu0 %v3241_v52, %s2972_s24 }
 0x4e1   : > { %1352 = vrot.lane.b32.xlu1 %v3254_v59, %s2972_s24 }
 0x4e2   : > { %1050 = vrot.lane.b32.xlu0 %v3252_v57, %s2971_s23 }
 0x4e5   : > { %1340 = vrot.lane.b32.xlu1 %v3219_v29, %s2972_s24 }
 0x4e6   : > { %1338 = vrot.lane.b32.xlu0 %v3198_v8, %s2972_s24 }
 0x4e9   : > { %1344 = vrot.lane.b32.xlu1 %v3252_v57, %s2972_s24 }
 0x4ea   : > { %1342 = vrot.lane.b32.xlu0 %v3239_v50, %s2972_s24 }
 0x510   : > { %v927_v1 = vpop.xlane.xlu0 %926 }
 0x514   : > { %v921_v38 = vpop.xlane.xlu0 %920  ;;  %v930_v2 = vpop.xlane.xlu1 %929 }
 0x515   : > { %2783 = vrcp.f32 %v930_v2 }
 0x516   : > { %2785 = vrcp.f32 %v921_v38 }
 0x517   : > { %2787 = vrcp.f32 %v927_v1 }
 0x518   : > { %v1057_v3 = vpop.permute.xlu0 %1056  ;;  %v924_v4 = vpop.xlane.xlu1 %923 }
 0x519   : > { %2789 = vrcp.f32 %v924_v4  ;;  %2629 = vmatprep.subr.msk.bf16.mxu1 %vm317_vm1, %v1057_v3  ;;  %v1077_v20 = vsel %vm317_vm1, %v1057_v3, 0 }
 0x51c   : > { %v1347_v5 = vpop.permute.xlu1 %1346 }
 0x51d   : > { %v1367_v6 = vsel %vm317_vm1, %v1347_v5, 0  ;;  %2633 = vmatprep.subr.msk.bf16.mxu0 %vm317_vm1, %v1347_v5 }
 0x51e   : > { %2526 = vmatpush3.bf16.xpose.msra.mxu0 %v1367_v6 }
 0x51f   : > { %v2784_v7 = vpop.eup %2783 }
 0x520   : > { %v2786_v39 = vpop.eup %2785  ;;  %v950_v14 = vmul.f32 %v2784_v7, %v3284_v28 }
 0x521   : > { %v2788_v9 = vpop.eup %2787  ;;  %v944_v15 = vmul.f32 %v2786_v39, %v3282_v27 }
 0x522   : > { %v948_v17 = vmul.f32 %v2788_v9, %v3278_v25 }
 0x523   : > { %v2790_v13 = vpop.eup %2789 }
 0x524   : > { %v946_v16 = vmul.f32 %v2790_v13, %v3290_v35  ;;  %v960_v19 = vpack.c.bf16 %v950_v14, %v948_v17 }
 0x526   : > { %v959_v18 = vpack.c.bf16 %v946_v16, %v944_v15 }
 0x528   : > { %2485 = vmatprep.mubr.msk.bf16.mxu1 %vm870_vm2, %v959_v18 }
 0x529   : > { %2486 = vmatmul.mubr.msk.bf16.vlgmr.msra.gmra.mrb[12].mxu1 %vm870_vm2, %v960_v19 }
 0x52a   : > { %2494 = vmatpush3.bf16.xpose.msra.mxu1 %v1077_v20 }
 0x52b   : > { %2630 = vmatprep.subr.msk.bf16.mxu1 %vm317_vm1, %v1059_v63 }
 0x532   : > { %2496 = vmatpush3.bf16.xpose.msra.mxu1 %v1080_v21 }
 0x533   : > { %2631 = vmatprep.subr.msk.bf16.mxu1 %vm317_vm1, %v1061_v0 }
 0x53a   : > { %2498 = vmatpush3.bf16.xpose.msra.mxu1 %v1083_v22 }
 0x549   : > { %v939_v23 = vpop.xlane.xlu0 %938 }
 0x54d   : > { %v933_v24 = vpop.xlane.xlu0 %932  ;;  %v942_v25 = vpop.xlane.xlu1 %941 }
 0x54e   : > { %2791 = vrcp.f32 %v942_v25 }
 0x54f   : > { %2793 = vrcp.f32 %v933_v24 }
 0x550   : > { %2795 = vrcp.f32 %v939_v23 }
 0x551   : > { %v1063_v26 = vpop.permute.xlu0 %1062  ;;  %v936_v27 = vpop.xlane.xlu1 %935 }
 0x552   : > { %v1086_v28 = vsel %vm317_vm1, %v1063_v26, 0  ;;  %2797 = vrcp.f32 %v936_v27  ;;  %2632 = vmatprep.subr.msk.bf16.mxu1 %vm317_vm1, %v1063_v26 }
 0x553   : > { %2500 = vmatpush3.bf16.xpose.msra.mxu1 %v1086_v28 }
 0x555   : > { %v1045_v30 = vpop.permute.xlu0 %1044  ;;  %v1349_v34 = vpop.permute.xlu1 %1348 }
 0x556   : > { %v1370_v35 = vsel %vm317_vm1, %v1349_v34, 0  ;;  %2634 = vmatprep.subr.msk.bf16.mxu0 %vm317_vm1, %v1349_v34 }
 0x557   : > { %2528 = vmatpush3.bf16.xpose.msra.mxu0 %v1370_v35 }
 0x558   : > { %v2792_v36 = vpop.eup %2791 }
 0x559   : > { %v1351_v37 = vpop.permute.xlu0 %1350  ;;  %v1047_v40 = vpop.permute.xlu1 %1046  ;;  %v958_v49 = vmul.f32 %v2792_v36, %v3304_v60 }
 0x55a   : > { %v2794_v41 = vpop.eup %2793  ;;  %2635 = vmatprep.subr.msk.bf16.mxu0 %vm317_vm1, %v1351_v37  ;;  %v1373_v46 = vsel %vm317_vm1, %v1351_v37, 0 }
 0x55b   : > { %v2796_v42 = vpop.eup %2795  ;;  %v952_v44 = vmul.f32 %v2794_v41, %v3300_v54 }
 0x55c   : > { %v2798_v48 = vpop.eup %2797  ;;  %v956_v47 = vmul.f32 %v2796_v42, %v3298_v51 }
 0x55d   : > { %v1051_v53 = vpop.permute.xlu0 %1050  ;;  %v1049_v43 = vpop.permute.xlu1 %1048  ;;  %v954_v45 = vmul.f32 %v2798_v48, %v3310_v61 }
 0x55e   : > { %v962_v56 = vpack.c.bf16 %v958_v49, %v956_v47 }
 0x55f   : > { %2530 = vmatpush3.bf16.xpose.msra.mxu0 %v1373_v46  ;;  %v961_v55 = vpack.c.bf16 %v954_v45, %v952_v44 }
 0x561   : > { %v1339_v58 = vpop.permute.xlu0 %1338  ;;  %2489 = vmatprep.mubr.msk.bf16.mxu1 %vm870_vm2, %v961_v55  ;;  %v1353_v62 = vpop.permute.xlu1 %1352 }
 0x562   : > { %2490 = vmatmul.mubr.msk.bf16.gmra.mrb[16].mxu1 %vm870_vm2, %v962_v56  ;;  %2636 = vmatprep.subr.msk.bf16.mxu0 %vm317_vm1, %v1353_v62  ;;  %v1376_v54 = vsel %vm317_vm1, %v1353_v62, 0 }
 0x563   : > { %2533 = vmatprep.mubr.msk.bf16.mxu0 %vm317_vm1, %v1339_v58  ;;  %2501 = vmatprep.mubr.msk.bf16.mxu1 %vm317_vm1, %v1045_v30 }
 0x565   : > { %v1341_v51 = vpop.permute.xlu1 %1340  ;;  %v1343_v60 = vpop.permute.xlu0 %1342 }
 0x567   : > { %2532 = vmatpush3.bf16.xpose.msra.mxu0 %v1376_v54 }
 0x569   : > { %v1345_v61 = vpop.permute.xlu1 %1344 }
 0x56a   : > { %2502 = vmatmul.mubr.msk.bf16.vlgmr.msra.gmra.mrb[20].mxu1 %vm317_vm1, %v1047_v40 }
 0x56b   : > { %2505 = vmatprep.mubr.msk.bf16.mxu1 %vm317_vm1, %v1049_v43 }
 0x56e   : > { %2534 = vmatmul.mubr.msk.bf16.vlgmr.msra.gmra.mrb[28].mxu0 %vm317_vm1, %v1341_v51 }
 0x56f   : > { %2537 = vmatprep.mubr.msk.bf16.mxu0 %vm317_vm1, %v1343_v60 }
 0x572   : > { %2506 = vmatmul.mubr.msk.bf16.gmra.mrb[24].mxu1 %vm317_vm1, %v1051_v53 }
 0x576   : > { %2538 = vmatmul.mubr.msk.bf16.gmra.mrb[32].mxu0 %vm317_vm1, %v1345_v61 }
 0x5fc   : > { %v3374_v63 = vpop.f32.mrb[12].mxu1 }
 0x5fd   : > { %v3376_v0 = vpop.f32.mrb[13].mxu1 }
 0x5fe   : > { %v3378_v1 = vpop.f32.mrb[14].mxu1 }
 0x5ff   : > { %v3380_v38 = vpop.f32.mrb[15].mxu1 }
 0x635   : > { %v3382_v2 = vpop.f32.mrb[16].mxu1 }
 0x636   : > { %v3384_v3 = vpop.f32.mrb[17].mxu1 }
 0x637   : > { %v3386_v4 = vpop.f32.mrb[18].mxu1 }
 0x638   : > { %v3388_v5 = vpop.f32.mrb[19].mxu1 }
 0x63d   : > { %v3390_v6 = vpop.f32.mrb[20].mxu1 }
 0x63e   : > { %v3392_v7 = vpop.f32.mrb[21].mxu1  ;;  %v1159_v37 = vsel %vm870_vm2, %v3390_v6, -inf }
 0x63f   : > { %v3394_v39 = vpop.f32.mrb[22].mxu1  ;;  %v1153_v41 = vsel %vm870_vm2, %v3392_v7, -inf }
 0x640   : > { %v3396_v9 = vpop.f32.mrb[23].mxu1  ;;  %v1162_v42 = vsel %vm870_vm2, %v3394_v39, -inf }
 0x641   : > { %v2535_v13 = vpop.f32.mrb[28].mxu0  ;;  %v1156_v40 = vsel %vm870_vm2, %v3396_v9, -inf }
 0x642   : > { %v1412_v14 = vpop.f32.mrb[29].mxu0  ;;  %v1449_v22 = vsel %vm870_vm2, %v2535_v13, -inf }
 0x643   : > { %v2536_v15 = vpop.f32.mrb[30].mxu0  ;;  %v1443_v16 = vsel %vm870_vm2, %v1412_v14, -inf }
 0x644   : > { %1444 = vmax.xlane.f32.xlu0 %v1443_v16  ;;  %v1415_v17 = vpop.f32.mrb[31].mxu0  ;;  %v1452_v25 = vsel %vm870_vm2, %v2536_v15, -inf }
 0x645   : > { %v3399_v18 = vpop.f32.mrb[24].mxu1  ;;  %v1446_v19 = vsel %vm870_vm2, %v1415_v17, -inf }
 0x646   : > { %v3402_v20 = vpop.f32.mrb[25].mxu1  ;;  %1447 = vmax.xlane.f32.xlu1 %v1446_v19  ;;  %v1171_v48 = vsel %vm870_vm2, %v3399_v18, -inf }
 0x647   : > { %v3404_v21 = vpop.f32.mrb[26].mxu1  ;;  %v1165_v49 = vsel %vm870_vm2, %v3402_v20, -inf }
 0x648   : > { %v3407_v23 = vpop.f32.mrb[27].mxu1  ;;  %1450 = vmax.xlane.f32.xlu0 %v1449_v22 }
 0x649   : > { %v3409_v24 = vpop.f32.mrb[32].mxu0 }
 0x64a   : > { %1453 = vmax.xlane.f32.xlu1 %v1452_v25  ;;  %v3412_v26 = vpop.f32.mrb[33].mxu0  ;;  %v1461_v35 = vsel %vm870_vm2, %v3409_v24, -inf }
 0x64b   : > { %v3414_v27 = vpop.f32.mrb[34].mxu0  ;;  %v1455_v28 = vsel %vm870_vm2, %v3412_v26, -inf }
 0x64c   : > { %1456 = vmax.xlane.f32.xlu0 %v1455_v28  ;;  %v3418_v30 = vpop.f32.mrb[35].mxu0  ;;  %v1464_v36 = vsel %vm870_vm2, %v3414_v27, -inf }
 0x64d   : > { %v1458_v34 = vsel %vm870_vm2, %v3418_v30, -inf }
 0x64e   : > { %1459 = vmax.xlane.f32.xlu1 %v1458_v34 }
 0x650   : > { %1462 = vmax.xlane.f32.xlu0 %v1461_v35 }
 0x652   : > { %1465 = vmax.xlane.f32.xlu1 %v1464_v36 }
 0x663   : > { %1251 = vrot.lane.b32.xlu1 %v3202_v11, %s2971_s23 }
 0x666   : > { %1249 = vrot.lane.b32.xlu0 %v3204_v12, %s2971_s23 }
 0x685   : > { %1160 = vmax.xlane.f32.xlu0 %v1159_v37 }
 0x687   : > { %1157 = vmax.xlane.f32.xlu1 %v1156_v40 }
 0x689   : > { %1154 = vmax.xlane.f32.xlu0 %v1153_v41 }
 0x68d   : > { %1163 = vmax.xlane.f32.xlu0 %v1162_v42 }
 0x691   : > { %1172 = vmax.xlane.f32.xlu0 %v1171_v48 }
 0x695   : > { %1166 = vmax.xlane.f32.xlu0 %v1165_v49 }
 0x6ab   : > { %1253 = vrot.lane.b32.xlu0 %v3226_v33, %s2971_s23 }
 0x6d1   : > { %v1445_v53 = vpop.xlane.xlu0 %1444 }
 0x6d2   : > { %v1467_v43 = vsub.f32 %v1412_v14, %v1445_v53 }
 0x6d3   : > { %v1448_v44 = vpop.xlane.xlu1 %1447 }
 0x6d4   : > { %v1475_v45 = vmul.f32 1.442695, %v1467_v43  ;;  %v1468_v46 = vsub.f32 %v1415_v17, %v1448_v44  ;;  %v1174_v44 = vsel %vm870_vm2, %v3404_v21, -inf }
 0x6d5   : > { %v1451_v47 = vpop.xlane.xlu0 %1450 }
 0x6d6   : > { %2799 = vpow2.f32 %v1475_v45  ;;  %v1477_v55 = vmul.f32 1.442695, %v1468_v46  ;;  %v1469_v56 = vsub.f32 %v2535_v13, %v1451_v47 }
 0x6d7   : > { %v1454_v58 = vpop.xlane.xlu1 %1453 }
 0x6d8   : > { %2801 = vpow2.f32 %v1477_v55  ;;  %v1479_v62 = vmul.f32 1.442695, %v1469_v56  ;;  %v1470_v54 = vsub.f32 %v2536_v15, %v1454_v58  ;;  %v1168_v55 = vsel %vm870_vm2, %v3407_v23, -inf }
 0x6d9   : > { %v3444_v51 = vpop.xlane.xlu0 %1456 }
 0x6da   : > { %2803 = vpow2.f32 %v1479_v62  ;;  %v1481_v60 = vmul.f32 1.442695, %v1470_v54  ;;  %v1471_v61 = vsub.f32 %v3412_v26, %v3444_v51 }
 0x6db   : > { %v3448_v16 = vpop.xlane.xlu1 %1459 }
 0x6dc   : > { %v1472_v14 = vsub.f32 %v3418_v30, %v3448_v16  ;;  %2805 = vpow2.f32 %v1481_v60 }
 0x6dd   : > { %v3452_v17 = vpop.xlane.xlu0 %1462 }
 0x6de   : > { %v1473_v13 = vsub.f32 %v3409_v24, %v3452_v17 }
 0x6df   : > { %v3456_v19 = vpop.xlane.xlu1 %1465 }
 0x6e0   : > { %v3458_v15 = vpop.eup %2799  ;;  %v1474_v22 = vsub.f32 %v3414_v27, %v3456_v19 }
 0x6e1   : > { %v1250_v25 = vpop.permute.xlu0 %1249  ;;  %v1491_v28 = vsel %vm870_vm2, %v3458_v15, 0.0 }
 0x6e2   : > { %v3464_v34 = vpop.eup %2801  ;;  %2509 = vmatprep.subr.bf16.mxu1 %v1250_v25  ;;  %1492 = vadd.xlane.f32.xlu1 %v1491_v28  ;;  %v1489_v26 = vmul.f32 1.442695, %v1474_v22 }
 0x6e3   : > { %2510 = vmatpush3.bf16.msra.mxu1 %v1250_v25  ;;  %v1252_v35 = vpop.permute.xlu1 %1251  ;;  %v1494_v36 = vsel %vm870_vm2, %v3464_v34, 0.0 }
 0x6e4   : > { %v3468_v37 = vpop.eup %2803  ;;  %1495 = vadd.xlane.f32.xlu0 %v1494_v36  ;;  %2511 = vmatprep.subr.bf16.mxu1 %v1252_v35 }
 0x6e5   : > { %v1497_v40 = vsel %vm870_vm2, %v3468_v37, 0.0 }
 0x6e6   : > { %v3472_v41 = vpop.eup %2805 }
 0x6e7   : > { %2512 = vmatpush3.bf16.msra.mxu1 %v1252_v35  ;;  %v1500_v42 = vsel %vm870_vm2, %v3472_v41, 0.0 }
 0x6e8   : > { %1498 = vadd.xlane.f32.xlu0 %v1497_v40 }
 0x6ec   : > { %1501 = vadd.xlane.f32.xlu0 %v1500_v42 }
 0x6f3   : > { %1255 = vrot.lane.b32.xlu1 %v3223_v32, %s2971_s23 }
 0x712   : > { %v1161_v48 = vpop.xlane.xlu0 %1160 }
 0x713   : > { %v1179_v49 = vsub.f32 %v3390_v6, %v1161_v48 }
 0x714   : > { %v1158_v28 = vpop.xlane.xlu1 %1157 }
 0x715   : > { %v1189_v53 = vmul.f32 1.442695, %v1179_v49  ;;  %v1178_v35 = vsub.f32 %v3396_v9, %v1158_v28  ;;  %v1487_v9 = vmul.f32 1.442695, %v1473_v13 }
 0x716   : > { %v1155_v43 = vpop.xlane.xlu0 %1154 }
 0x717   : > { %2807 = vpow2.f32 %v1189_v53  ;;  %v1177_v45 = vsub.f32 %v3392_v7, %v1155_v43  ;;  %1175 = vmax.xlane.f32.xlu1 %v1174_v44  ;;  %v1187_v42 = vmul.f32 1.442695, %v1178_v35  ;;  %v1483_v43 = vmul.f32 1.442695, %v1471_v61 }
 0x719   : > { %v1185_v46 = vmul.f32 1.442695, %v1177_v45 }
 0x71a   : > { %v1164_v47 = vpop.xlane.xlu0 %1163 }
 0x71b   : > { %2809 = vpow2.f32 %v1185_v46  ;;  %1169 = vmax.xlane.f32.xlu1 %v1168_v55  ;;  %v1180_v25 = vsub.f32 %v3394_v39, %v1164_v47 }
 0x71d   : > { %v1191_v36 = vmul.f32 1.442695, %v1180_v25 }
 0x71e   : > { %v1173_v56 = vpop.xlane.xlu0 %1172 }
 0x71f   : > { %v1183_v40 = vsub.f32 %v3399_v18, %v1173_v56  ;;  %2811 = vpow2.f32 %v1191_v36 }
 0x720   : > { %2813 = vpow2.f32 %v1187_v42 }
 0x721   : > { %v3484_v58 = vpop.eup %2807  ;;  %v1197_v49 = vmul.f32 1.442695, %v1183_v40 }
 0x722   : > { %v1167_v6 = vpop.xlane.xlu0 %1166  ;;  %v1207_v62 = vsel %vm870_vm2, %v3484_v58, 0.0 }
 0x723   : > { %1208 = vadd.xlane.f32.xlu0 %v1207_v62  ;;  %v1181_v48 = vsub.f32 %v3402_v20, %v1167_v6  ;;  %2815 = vpow2.f32 %v1197_v49 }
 0x725   : > { %v3488_v54 = vpop.eup %2809  ;;  %v1193_v53 = vmul.f32 1.442695, %v1181_v48 }
 0x726   : > { %v1254_v60 = vpop.permute.xlu0 %1253  ;;  %v1201_v7 = vsel %vm870_vm2, %v3488_v54, 0.0 }
 0x727   : > { %1202 = vadd.xlane.f32.xlu0 %v1201_v7  ;;  %2513 = vmatprep.subr.bf16.mxu1 %v1254_v60  ;;  %2817 = vpow2.f32 %v1193_v53 }
 0x728   : > { %2514 = vmatpush3.bf16.msra.mxu1 %v1254_v60  ;;  %2819 = vpow2.f32 %v1483_v43 }
 0x729   : > { %v3505_v39 = vpop.eup %2811  ;;  %2821 = vpow2.f32 %v1487_v9 }
 0x72a   : > { %v1210_v18 = vsel %vm870_vm2, %v3505_v39, 0.0  ;;  %v3512_v20 = vpop.eup %2813  ;;  %2823 = vpow2.f32 %v1489_v26 }
 0x72b   : > { %v1204_v61 = vsel %vm870_vm2, %v3512_v20, 0.0 }
 0x72c   : > { %1537 = vrot.lane.b32.xlu1 %v3202_v11, %s2972_s24 }
 0x72d   : > { %v3517_v51 = vpop.eup %2815 }
 0x72e   : > { %v1219_v17 = vsel %vm870_vm2, %v3517_v51, 0.0 }
 0x730   : > { %1539 = vrot.lane.b32.xlu1 %v3226_v33, %s2972_s24 }
 0x731   : > { %v3521_v44 = vpop.eup %2817 }
 0x732   : > { %v1213_v24 = vsel %vm870_vm2, %v3521_v44, 0.0  ;;  %v3527_v13 = vpop.eup %2819 }
 0x733   : > { %v1503_v27 = vsel %vm870_vm2, %v3527_v13, 0.0  ;;  %v3531_v19 = vpop.eup %2821 }
 0x734   : > { %v1509_v22 = vsel %vm870_vm2, %v3531_v19, 0.0  ;;  %v3535_v45 = vpop.eup %2823 }
 0x735   : > { %v1512_v46 = vsel %vm870_vm2, %v3535_v45, 0.0 }
 0x73d   : > { %1535 = vrot.lane.b32.xlu0 %v3204_v12, %s2972_s24 }
 0x754   : > { %1211 = vadd.xlane.f32.xlu1 %v1210_v18 }
 0x758   : > { %1205 = vadd.xlane.f32.xlu1 %v1204_v61  ;;  %v1485_v61 = vmul.f32 1.442695, %v1472_v14 }
 0x75c   : > { %1214 = vadd.xlane.f32.xlu0 %v1213_v24  ;;  %1220 = vadd.xlane.f32.xlu1 %v1219_v17 }
 0x760   : > { %1504 = vadd.xlane.f32.xlu0 %v1503_v27 }
 0x764   : > { %1510 = vadd.xlane.f32.xlu0 %v1509_v22 }
 0x768   : > { %1513 = vadd.xlane.f32.xlu0 %v1512_v46 }
 0x76f   : > { %v1493_v47 = vpop.xlane.xlu1 %1492 }
 0x770   : > { %2825 = vrcp.f32 %v1493_v47 }
 0x771   : > { %v1496_v55 = vpop.xlane.xlu0 %1495 }
 0x772   : > { %2827 = vrcp.f32 %v1496_v55 }
 0x773   : > { %v1256_v56 = vpop.permute.xlu1 %1255 }
 0x774   : > { %2515 = vmatprep.subr.bf16.mxu1 %v1256_v56 }
 0x775   : > { %v1499_v6 = vpop.xlane.xlu0 %1498  ;;  %2516 = vmatpush3.bf16.msra.mxu1 %v1256_v56 }
 0x776   : > { %2829 = vrcp.f32 %v1499_v6 }
 0x779   : > { %v1502_v62 = vpop.xlane.xlu0 %1501 }
 0x77a   : > { %v2826_v60 = vpop.eup %2825  ;;  %2831 = vrcp.f32 %v1502_v62 }
 0x77b   : > { %v3540_v25 = vmul.f32 %v2826_v60, %v3458_v15 }
 0x77c   : > { %v2828_v7 = vpop.eup %2827 }
 0x77d   : > { %v3543_v28 = vmul.f32 %v2828_v7, %v3464_v34 }
 0x77e   : > { %1632 = vrot.lane.b32.xlu0 %v3200_v10, %s2973_s25 }
 0x77f   : > { %v1531_v35 = vpack.c.bf16 %v3543_v28, %v3540_v25 }
 0x780   : > { %v2830_v36 = vpop.eup %2829 }
 0x781   : > { %v3552_v42 = vmul.f32 %v2830_v36, %v3468_v37 }
 0x782   : > { %1624 = vrot.lane.b32.xlu0 %v3198_v8, %s2973_s25 }
 0x784   : > { %v2832_v40 = vpop.eup %2831 }
 0x785   : > { %v3555_v15 = vmul.f32 %v2832_v40, %v3472_v41 }
 0x786   : > { %1628 = vrot.lane.b32.xlu0 %v3239_v50, %s2973_s25 }
 0x787   : > { %v1532_v10 = vpack.c.bf16 %v3555_v15, %v3552_v42 }
 0x7a4   : > { %v1176_v34 = vpop.xlane.xlu1 %1175 }
 0x7a5   : > { %v1184_v48 = vsub.f32 %v3404_v21, %v1176_v34 }
 0x7a7   : > { %v1199_v49 = vmul.f32 1.442695, %v1184_v48 }
 0x7a8   : > { %v1170_v53 = vpop.xlane.xlu1 %1169 }
 0x7a9   : > { %2833 = vpow2.f32 %v1199_v49  ;;  %v1182_v8 = vsub.f32 %v3407_v23, %v1170_v53 }
 0x7ab   : > { %v1195_v43 = vmul.f32 1.442695, %v1182_v8 }
 0x7ac   : > { %v1538_v23 = vpop.permute.xlu1 %1537 }
 0x7ad   : > { %2835 = vpow2.f32 %v1195_v43 }
 0x7ae   : > { %2837 = vpow2.f32 %v1485_v61 }
 0x7b0   : > { %v1209_v37 = vpop.xlane.xlu0 %1208  ;;  %v1540_v24 = vpop.permute.xlu1 %1539 }
 0x7b3   : > { %v3563_v9 = vpop.eup %2833 }
 0x7b4   : > { %v1203_v41 = vpop.xlane.xlu0 %1202  ;;  %v1222_v50 = vsel %vm870_vm2, %v3563_v9, 0.0 }
 0x7b5   : > { %1223 = vadd.xlane.f32.xlu1 %v1222_v50 }
 0x7b7   : > { %v3567_v18 = vpop.eup %2835 }
 0x7b8   : > { %v1536_v26 = vpop.permute.xlu0 %1535  ;;  %v1216_v21 = vsel %vm870_vm2, %v3567_v18, 0.0  ;;  %v3576_v22 = vpop.eup %2837 }
 0x7b9   : > { %2541 = vmatprep.subr.bf16.mxu1 %v1536_v26  ;;  %1217 = vadd.xlane.f32.xlu1 %v1216_v21  ;;  %v1506_v47 = vsel %vm870_vm2, %v3576_v22, 0.0 }
 0x7ca   : > { %1541 = vrot.lane.b32.xlu1 %v3223_v32, %s2972_s24 }
 0x7e1   : > { %v1212_v17 = vpop.xlane.xlu1 %1211 }
 0x7e2   : > { %2839 = vrcp.f32 %v1212_v17 }
 0x7e3   : > { %2841 = vrcp.f32 %v1203_v41 }
 0x7e4   : > { %2843 = vrcp.f32 %v1209_v37 }
 0x7e5   : > { %v1206_v27 = vpop.xlane.xlu1 %1205 }
 0x7e6   : > { %2845 = vrcp.f32 %v1206_v27 }
 0x7ec   : > { %v2840_v46 = vpop.eup %2839 }
 0x7ed   : > { %v2842_v55 = vpop.eup %2841  ;;  %v1232_v30 = vmul.f32 %v2840_v46, %v3505_v39  ;;  %v1221_v39 = vpop.xlane.xlu1 %1220 }
 0x7ee   : > { %1507 = vadd.xlane.f32.xlu1 %v1506_v47  ;;  %v2844_v56 = vpop.eup %2843  ;;  %v1226_v16 = vmul.f32 %v2842_v55, %v3488_v54 }
 0x7ef   : > { %v1230_v62 = vmul.f32 %v2844_v56, %v3484_v58  ;;  %v1215_v58 = vpop.xlane.xlu0 %1214 }
 0x7f0   : > { %v2846_v6 = vpop.eup %2845 }
 0x7f1   : > { %v1228_v14 = vmul.f32 %v2846_v6, %v3512_v20  ;;  %v1242_v7 = vpack.c.bf16 %v1232_v30, %v1230_v62 }
 0x7f3   : > { %v1241_v60 = vpack.c.bf16 %v1228_v14, %v1226_v16  ;;  %v1505_v54 = vpop.xlane.xlu0 %1504 }
 0x7f5   : > { %2517 = vmatprep.mubr.msk.bf16.mxu1 %vm870_vm2, %v1241_v60 }
 0x7f6   : > { %2518 = vmatmul.mubr.msk.bf16.vlgmr.msra.gmra.mrb[28].mxu1 %vm870_vm2, %v1242_v7 }
 0x7f7   : > { %2542 = vmatpush3.bf16.msra.mxu1 %v1536_v26  ;;  %v1511_v20 = vpop.xlane.xlu0 %1510 }
 0x7f8   : > { %2543 = vmatprep.subr.bf16.mxu1 %v1538_v23 }
 0x7fb   : > { %2544 = vmatpush3.bf16.msra.mxu1 %v1538_v23 }
 0x7fc   : > { %2545 = vmatprep.subr.bf16.mxu1 %v1540_v24 }
 0x7ff   : > { %2546 = vmatpush3.bf16.msra.mxu1 %v1540_v24  ;;  %1634 = vrot.lane.b32.xlu1 %v3221_v31, %s2973_s25  ;;  %v1514_v31 = vpop.xlane.xlu0 %1513 }
 0x803   : > { %1636 = vrot.lane.b32.xlu1 %v3241_v52, %s2973_s25 }
 0x807   : > { %1638 = vrot.lane.b32.xlu1 %v3254_v59, %s2973_s25  ;;  %v1633_v59 = vpop.permute.xlu0 %1632 }
 0x808   : > { %v1653_v50 = vsel %vm317_vm1, %v1633_v59, 0 }
 0x80b   : > { %1626 = vrot.lane.b32.xlu1 %v3219_v29, %s2973_s25  ;;  %v1625_v27 = vpop.permute.xlu0 %1624 }
 0x80f   : > { %1630 = vrot.lane.b32.xlu1 %v3252_v57, %s2973_s25 }
 0x842   : > { %v1224_v36 = vpop.xlane.xlu1 %1223 }
 0x843   : > { %2847 = vrcp.f32 %v1224_v36 }
 0x844   : > { %2849 = vrcp.f32 %v1215_v58 }
 0x845   : > { %2851 = vrcp.f32 %v1221_v39 }
 0x846   : > { %v1218_v40 = vpop.xlane.xlu1 %1217 }
 0x847   : > { %2853 = vrcp.f32 %v1218_v40 }
 0x848   : > { %2855 = vrcp.f32 %v1514_v31 }
 0x849   : > { %2857 = vrcp.f32 %v1505_v54 }
 0x84a   : > { %v1542_v52 = vpop.permute.xlu1 %1541  ;;  %2859 = vrcp.f32 %v1511_v20 }
 0x84b   : > { %2547 = vmatprep.subr.bf16.mxu1 %v1542_v52 }
 0x84c   : > { %2548 = vmatpush3.bf16.msra.mxu1 %v1542_v52 }
 0x84d   : > { %2637 = vmatprep.subr.msk.bf16.mxu1 %vm317_vm1, %v1633_v59  ;;  %v2848_v29 = vpop.eup %2847 }
 0x84e   : > { %v2850_v34 = vpop.eup %2849  ;;  %v1240_v49 = vmul.f32 %v2848_v29, %v3563_v9 }
 0x84f   : > { %v2852_v57 = vpop.eup %2851  ;;  %v1234_v53 = vmul.f32 %v2850_v34, %v3521_v44 }
 0x850   : > { %v1238_v43 = vmul.f32 %v2852_v57, %v3517_v51 }
 0x851   : > { %v2854_v48 = vpop.eup %2853 }
 0x852   : > { %v1236_v8 = vmul.f32 %v2854_v48, %v3567_v18  ;;  %v1244_v41 = vpack.c.bf16 %v1240_v49, %v1238_v43  ;;  %v2856_v25 = vpop.eup %2855 }
 0x854   : > { %v1243_v37 = vpack.c.bf16 %v1236_v8, %v1234_v53 }
 0x856   : > { %2521 = vmatprep.mubr.msk.bf16.mxu1 %vm870_vm2, %v1243_v37 }
 0x857   : > { %2522 = vmatmul.mubr.msk.bf16.gmra.mrb[32].mxu1 %vm870_vm2, %v1244_v41 }
 0x858   : > { %2549 = vmatprep.mubr.msk.bf16.mxu1 %vm870_vm2, %v1531_v35  ;;  %v2858_v35 = vpop.eup %2857 }
 0x859   : > { %v2860_v42 = vpop.eup %2859  ;;  %v1524_v18 = vmul.f32 %v2858_v35, %v3527_v13 }
 0x85a   : > { %v1528_v23 = vmul.f32 %v2860_v42, %v3531_v19 }
 0x85f   : > { %2550 = vmatmul.mubr.msk.bf16.vlgmr.msra.gmra.mrb[36].mxu1 %vm870_vm2, %v1532_v10  ;;  %v1530_v10 = vmul.f32 %v2856_v25, %v3535_v45 }
 0x860   : > { %2558 = vmatpush3.bf16.xpose.msra.mxu1 %v1653_v50 }
 0x861   : > { %v1534_v17 = vpack.c.bf16 %v1530_v10, %v1528_v23 }
 0x87b   : > { %v1508_v51 = vpop.xlane.xlu1 %1507 }
 0x87c   : > { %2861 = vrcp.f32 %v1508_v51 }
 0x87f   : > { %v1635_v44 = vpop.permute.xlu1 %1634 }
 0x880   : > { %v1656_v9 = vsel %vm317_vm1, %v1635_v44, 0  ;;  %2638 = vmatprep.subr.msk.bf16.mxu1 %vm317_vm1, %v1635_v44 }
 0x881   : > { %2560 = vmatpush3.bf16.xpose.msra.mxu1 %v1656_v9 }
 0x883   : > { %v1637_v28 = vpop.permute.xlu1 %1636 }
 0x884   : > { %2639 = vmatprep.subr.msk.bf16.mxu1 %vm317_vm1, %v1637_v28  ;;  %v1659_v21 = vsel %vm317_vm1, %v1637_v28, 0 }
 0x886   : > { %v2862_v15 = vpop.eup %2861 }
 0x887   : > { %v1526_v26 = vmul.f32 %v2862_v15, %v3576_v22  ;;  %v1639_v61 = vpop.permute.xlu1 %1638  ;;  %v1629_v22 = vpop.permute.xlu0 %1628 }
 0x888   : > { %v1662_v13 = vsel %vm317_vm1, %v1639_v61, 0 }
 0x889   : > { %2562 = vmatpush3.bf16.xpose.msra.mxu1 %v1659_v21  ;;  %v1533_v24 = vpack.c.bf16 %v1526_v26, %v1524_v18 }
 0x88a   : > { %2640 = vmatprep.subr.msk.bf16.mxu1 %vm317_vm1, %v1639_v61 }
 0x88b   : > { %2553 = vmatprep.mubr.msk.bf16.mxu1 %vm870_vm2, %v1533_v24  ;;  %v1627_v45 = vpop.permute.xlu1 %1626 }
 0x88c   : > { %2554 = vmatmul.mubr.msk.bf16.gmra.mrb[40].mxu1 %vm870_vm2, %v1534_v17 }
 0x88d   : > { %2565 = vmatprep.mubr.msk.bf16.mxu1 %vm317_vm1, %v1625_v27 }
 0x88f   : > { %v1631_v19 = vpop.permute.xlu1 %1630 }
 0x891   : > { %2564 = vmatpush3.bf16.xpose.msra.mxu1 %v1662_v13 }
 0x898   : > { %2566 = vmatmul.mubr.msk.bf16.vlgmr.msra.gmra.mrb[44].mxu1 %vm317_vm1, %v1627_v45 }
 0x899   : > { %2569 = vmatprep.mubr.msk.bf16.mxu1 %vm317_vm1, %v1629_v22 }
 0x8a0   : > { %2570 = vmatmul.mubr.msk.bf16.gmra.mrb[48].mxu1 %vm317_vm1, %v1631_v19 }
 0x8c9   : > { %v3628_v46 = vpop.f32.mrb[28].mxu1 }
 0x8ca   : > { %v3630_v47 = vpop.f32.mrb[29].mxu1 }
 0x8cb   : > { %v3632_v55 = vpop.f32.mrb[30].mxu1 }
 0x8cc   : > { %v2694_v56 = vpack.i.bf16 %v3632_v55, %v3628_v46  ;;  %v3636_v6 = vpop.f32.mrb[31].mxu1 }
 0x8cd   : > { %v2689_v30 = vpack.i.bf16 %v3636_v6, %v3630_v47 }
 0x92a   : > { %v3640_v16 = vpop.f32.mrb[32].mxu1 }
 0x92b   : > { %v3642_v14 = vpop.f32.mrb[33].mxu1 }
 0x92c   : > { %v3644_v62 = vpop.f32.mrb[34].mxu1 }
 0x92d   : > { %v2714_v60 = vpack.i.bf16 %v3644_v62, %v3640_v16  ;;  %v3648_v7 = vpop.f32.mrb[35].mxu1 }
 0x92e   : > { %v2709_v58 = vpack.i.bf16 %v3648_v7, %v3642_v14 }
 0x932   : > { %v3652_v54 = vpop.f32.mrb[36].mxu1 }
 0x933   : > { %v3654_v39 = vpop.f32.mrb[37].mxu1 }
 0x934   : > { %v3656_v20 = vpop.f32.mrb[38].mxu1 }
 0x935   : > { %v2704_v36 = vpack.i.bf16 %v3656_v20, %v3652_v54  ;;  %v3660_v31 = vpop.f32.mrb[39].mxu1 }
 0x936   : > { %v2699_v40 = vpack.i.bf16 %v3660_v31, %v3654_v39 }
 0x95f   : > { %v3664_v52 = vpop.f32.mrb[40].mxu1 }
 0x960   : > { %v3666_v59 = vpop.f32.mrb[41].mxu1 }
 0x961   : > { %v3668_v29 = vpop.f32.mrb[42].mxu1 }
 0x962   : > { %v2734_v34 = vpack.i.bf16 %v3668_v29, %v3664_v52  ;;  %v3672_v57 = vpop.f32.mrb[43].mxu1 }
 0x963   : > { %v2729_v48 = vpack.i.bf16 %v3672_v57, %v3666_v59 }
 0x96b   : > { %v2567_v49 = vpop.f32.mrb[44].mxu1 }
 0x96c   : > { %v1698_v53 = vpop.f32.mrb[45].mxu1  ;;  %v1735_v50 = vsel %vm870_vm2, %v2567_v49, -inf }
 0x96d   : > { %v2568_v8 = vpop.f32.mrb[46].mxu1  ;;  %v1729_v43 = vsel %vm870_vm2, %v1698_v53, -inf }
 0x96e   : > { %1730 = vmax.xlane.f32.xlu0 %v1729_v43  ;;  %v1701_v37 = vpop.f32.mrb[47].mxu1  ;;  %v1738_v25 = vsel %vm870_vm2, %v2568_v8, -inf }
 0x96f   : > { %v1732_v41 = vsel %vm870_vm2, %v1701_v37, -inf }
 0x970   : > { %1733 = vmax.xlane.f32.xlu1 %v1732_v41 }
 0x972   : > { %1736 = vmax.xlane.f32.xlu0 %v1735_v50 }
 0x973   : > { %v2571_v51 = vpop.f32.mrb[48].mxu1 }
 0x974   : > { %v1714_v44 = vpop.f32.mrb[49].mxu1  ;;  %v1747_v10 = vsel %vm870_vm2, %v2571_v51, -inf }
 0x975   : > { %v3679_v9 = vpop.f32.mrb[50].mxu1  ;;  %v1741_v42 = vsel %vm870_vm2, %v1714_v44, -inf }
 0x976   : > { %1739 = vmax.xlane.f32.xlu0 %v1738_v25  ;;  %v1717_v28 = vpop.f32.mrb[51].mxu1  ;;  %v1750_v15 = vsel %vm870_vm2, %v3679_v9, -inf }
 0x977   : > { %v1744_v35 = vsel %vm870_vm2, %v1717_v28, -inf }
 0x978   : > { %1745 = vmax.xlane.f32.xlu1 %v1744_v35 }
 0x97a   : > { %1742 = vmax.xlane.f32.xlu0 %v1741_v42 }
 0x97c   : > { %1751 = vmax.xlane.f32.xlu1 %v1750_v15 }
 0x97e   : > { %1748 = vmax.xlane.f32.xlu0 %v1747_v10 }
 0x9fb   : > { %v1731_v18 = vpop.xlane.xlu0 %1730 }
 0x9fc   : > { %v1753_v26 = vsub.f32 %v1698_v53, %v1731_v18 }
 0x9fd   : > { %v1734_v21 = vpop.xlane.xlu1 %1733 }
 0x9fe   : > { %v1761_v24 = vmul.f32 1.442695, %v1753_v26  ;;  %v1754_v17 = vsub.f32 %v1701_v37, %v1734_v21 }
 0x9ff   : > { %v1737_v23 = vpop.xlane.xlu0 %1736 }
 0xa00   : > { %v1755_v61 = vsub.f32 %v2567_v49, %v1737_v23  ;;  %v1763_v22 = vmul.f32 1.442695, %v1754_v17 }
 0xa02   : > { %v1765_v27 = vmul.f32 1.442695, %v1755_v61 }
 0xa03   : > { %v1740_v13 = vpop.xlane.xlu0 %1739 }
 0xa04   : > { %2863 = vpow2.f32 %v1765_v27  ;;  %v1756_v45 = vsub.f32 %v2568_v8, %v1740_v13 }
 0xa05   : > { %2865 = vpow2.f32 %v1761_v24  ;;  %v1746_v61 = vpop.xlane.xlu1 %1745 }
 0xa06   : > { %v1767_v19 = vmul.f32 1.442695, %v1756_v45 }
 0xa07   : > { %v1743_v43 = vpop.xlane.xlu0 %1742 }
 0xa08   : > { %2867 = vpow2.f32 %v1767_v19  ;;  %v1757_v41 = vsub.f32 %v1714_v44, %v1743_v43 }
 0xa09   : > { %2869 = vpow2.f32 %v1763_v22  ;;  %v1752_v24 = vpop.xlane.xlu1 %1751 }
 0xa0a   : > { %v1769_v53 = vmul.f32 1.442695, %v1757_v41  ;;  %v1760_v17 = vsub.f32 %v3679_v9, %v1752_v24 }
 0xa0b   : > { %v1749_v50 = vpop.xlane.xlu0 %1748 }
 0xa0c   : > { %v1759_v25 = vsub.f32 %v2571_v51, %v1749_v50  ;;  %v1775_v27 = vmul.f32 1.442695, %v1760_v17 }
 0xa0e   : > { %v3687_v35 = vpop.eup %2863  ;;  %v1773_v42 = vmul.f32 1.442695, %v1759_v25 }
 0xa0f   : > { %v1783_v49 = vsel %vm870_vm2, %v3687_v35, 0.0  ;;  %v2866_v37 = vpop.eup %2865 }
 0xa10   : > { %2871 = vpow2.f32 %v1773_v42  ;;  %1784 = vadd.xlane.f32.xlu0 %v1783_v49  ;;  %v1777_v15 = vsel %vm870_vm2, %v2866_v37, 0.0 }
 0xa11   : > { %2873 = vpow2.f32 %v1769_v53 }
 0xa12   : > { %v3691_v8 = vpop.eup %2867  ;;  %2875 = vpow2.f32 %v1775_v27 }
 0xa13   : > { %v1786_v44 = vsel %vm870_vm2, %v3691_v8, 0.0  ;;  %v2870_v10 = vpop.eup %2869 }
 0xa14   : > { %1778 = vadd.xlane.f32.xlu0 %v1777_v15  ;;  %1787 = vadd.xlane.f32.xlu1 %v1786_v44  ;;  %v1780_v51 = vsel %vm870_vm2, %v2870_v10, 0.0  ;;  %v2758_v44 = vld [vmem:[%s3906_s6 + $0x8] sm:$0xff]  }
 0xa18   : > { %1781 = vadd.xlane.f32.xlu1 %v1780_v51  ;;  %v2760_v51 = vld [vmem:[%s3906_s6 + $0x18] sm:$0xff]  }
 0xa1a   : > { %v3697_v18 = vpop.eup %2871 }
 0xa1b   : > { %v1795_v26 = vsel %vm870_vm2, %v3697_v18, 0.0  ;;  %v3701_v21 = vpop.eup %2873 }
 0xa1c   : > { %1796 = vadd.xlane.f32.xlu0 %v1795_v26  ;;  %v1789_v23 = vsel %vm870_vm2, %v3701_v21, 0.0  ;;  %v2762_v26 = vld [vmem:[%s3906_s6 + $0x28] sm:$0xff]  }
 0xa20   : > { %1790 = vadd.xlane.f32.xlu0 %v1789_v23  ;;  %v2764_v23 = vld [vmem:[%s3906_s6 + $0x38] sm:$0xff]  }
 0xa29   : > { %1823 = vrot.lane.b32.xlu1 %v3202_v11, %s2973_s25  ;;  %v1758_v11 = vsub.f32 %v1717_v28, %v1746_v61 }
 0xa2d   : > { %1825 = vrot.lane.b32.xlu1 %v3226_v33, %s2973_s25  ;;  %v2876_v33 = vpop.eup %2875 }
 0xa2e   : > { %v1798_v47 = vsel %vm870_vm2, %v2876_v33, 0.0 }
 0xa36   : > { %1821 = vrot.lane.b32.xlu0 %v3204_v12, %s2973_s25  ;;  %v1771_v12 = vmul.f32 1.442695, %v1758_v11 }
 0xa38   : > { %2877 = vpow2.f32 %v1771_v12 }
 0xa3a   : > { %2690 = vrot.lane.b32.xlu0 %v2689_v30, %s2973_s25 }
 0xa3e   : > { %2700 = vrot.lane.b32.xlu0 %v2699_v40, %s2972_s24 }
 0xa42   : > { %2710 = vrot.lane.b32.xlu0 %v2709_v58, %s2973_s25  ;;  %v2878_v6 = vpop.eup %2877 }
 0xa43   : > { %v1792_v30 = vsel %vm870_vm2, %v2878_v6, 0.0 }
 0xa51   : > { %1799 = vadd.xlane.f32.xlu1 %v1798_v47 }
 0xa55   : > { %1793 = vadd.xlane.f32.xlu1 %v1792_v30 }
 0xa66   : > { %1827 = vrot.lane.b32.xlu1 %v3223_v32, %s2973_s25 }
 0xa6a   : > { %2695 = vrot.lane.b32.xlu1 %v2694_v56, %s2973_s25 }
 0xa6e   : > { %2705 = vrot.lane.b32.xlu1 %v2704_v36, %s2972_s24 }
 0xa72   : > { %2715 = vrot.lane.b32.xlu1 %v2714_v60, %s2973_s25  ;;  %s2334_s25 = sshll.u32 %s3043_s9, 10 }
 0xa73   : > { %s3846_s9 = scalar_lea.hbm %s3908_s8, %s2334_s25 }
 0xa9d   : > { %v1785_v14 = vpop.xlane.xlu0 %1784 }
 0xaa1   : > { %v1779_v7 = vpop.xlane.xlu0 %1778  ;;  %v1788_v58 = vpop.xlane.xlu1 %1787 }
 0xaa2   : > { %2879 = vrcp.f32 %v1779_v7 }
 0xaa5   : > { %v1782_v32 = vpop.xlane.xlu1 %1781 }
 0xaa6   : > { %2881 = vrcp.f32 %v1782_v32 }
 0xaa7   : > { %2883 = vrcp.f32 %v1788_v58 }
 0xaa8   : > { %2885 = vrcp.f32 %v1785_v14 }
 0xaa9   : > { %v1797_v39 = vpop.xlane.xlu0 %1796  ;;  %v1824_v56 = vpop.permute.xlu1 %1823 }
 0xaac   : > { %v2880_v46 = vpop.eup %2879 }
 0xaad   : > { %v1791_v31 = vpop.xlane.xlu0 %1790  ;;  %v1802_v9 = vmul.f32 %v2880_v46, %v2866_v37  ;;  %v1826_v16 = vpop.permute.xlu1 %1825 }
 0xab0   : > { %v2882_v55 = vpop.eup %2881 }
 0xab1   : > { %v1822_v40 = vpop.permute.xlu0 %1821  ;;  %v1804_v54 = vmul.f32 %v2882_v55, %v2870_v10  ;;  %v2884_v60 = vpop.eup %2883  ;;  %v2759_v10 = vld [vmem:[%s3906_s6 + $0x10] sm:$0xff]  }
 0xab2   : > { %2573 = vmatprep.subr.bf16.mxu0 %v1822_v40  ;;  %v2886_v28 = vpop.eup %2885  ;;  %v1808_v13 = vmul.f32 %v2884_v60, %v3691_v8 }
 0xab3   : > { %2574 = vmatpush3.bf16.msra.mxu0 %v1822_v40  ;;  %v1817_v20 = vpack.c.bf16 %v1804_v54, %v1802_v9  ;;  %v1806_v22 = vmul.f32 %v2886_v28, %v3687_v35  ;;  %v2757_v35 = vld [vmem:[%s3906_s6] sm:$0xff]  }
 0xab4   : > { %2575 = vmatprep.subr.bf16.mxu0 %v1824_v56 }
 0xab5   : > { %2581 = vmatprep.mubr.msk.bf16.mxu0 %vm870_vm2, %v1817_v20  ;;  %v1818_v19 = vpack.c.bf16 %v1808_v13, %v1806_v22  ;;  %v2691_v32 = vpop.permute.xlu0 %2690 }
 0xab6   : > { %v2692_v52 = vunpack.i.l.bf16 %v2691_v32  ;;  %v2693_v29 = vunpack.i.h.bf16 %v2691_v32 }
 0xab7   : > { %2576 = vmatpush3.bf16.msra.mxu0 %v1824_v56 }
 0xab8   : > { %2577 = vmatprep.subr.bf16.mxu0 %v1826_v16  ;;  %v2006_v40 = vsel %vm317_vm1, %v3376_v0, %v2692_v52  ;;  %v2007_v54 = vsel %vm317_vm1, %v3380_v38, %v2693_v29 }
 0xabb   : > { %2578 = vmatpush3.bf16.msra.mxu0 %v1826_v16 }
 0xade   : > { %v1800_v62 = vpop.xlane.xlu1 %1799 }
 0xadf   : > { %2887 = vrcp.f32 %v1800_v62 }
 0xae0   : > { %2889 = vrcp.f32 %v1791_v31  ;;  %v2701_v31 = vpop.permute.xlu0 %2700 }
 0xae1   : > { %2891 = vrcp.f32 %v1797_v39  ;;  %v2703_v9 = vunpack.i.h.bf16 %v2701_v31 }
 0xae2   : > { %v1794_v36 = vpop.xlane.xlu1 %1793 }
 0xae3   : > { %2893 = vrcp.f32 %v1794_v36  ;;  %v2015_v38 = vsel %vm870_vm2, %v2007_v54, %v2703_v9  ;;  %v2898_v54 = vld [vmem:[%s3087_s13 + $0x8] sm:$0xff] }
 0xae4   : > { %v2711_v55 = vpop.permute.xlu0 %2710 }
 0xae6   : > { %v1828_v45 = vpop.permute.xlu1 %1827 }
 0xae7   : > { %2579 = vmatprep.subr.bf16.mxu0 %v1828_v45 }
 0xae8   : > { %2580 = vmatpush3.bf16.msra.mxu0 %v1828_v45 }
 0xae9   : > { %v2888_v43 = vpop.eup %2887  ;;  %2589 = vmatprep.subr.bf16.mxu0 %v2757_v35 }
 0xaea   : > { %v2890_v41 = vpop.eup %2889  ;;  %v1816_v53 = vmul.f32 %v2888_v43, %v2876_v33  ;;  %v2696_v58 = vpop.permute.xlu1 %2695  ;;  %v2713_v43 = vunpack.i.h.bf16 %v2711_v55 }
 0xaeb   : > { %2582 = vmatmul.mubr.msk.bf16.vlgmr.msra.gmra.mrb[36].mxu0 %vm870_vm2, %v1818_v19  ;;  %v2892_v50 = vpop.eup %2891  ;;  %v1810_v42 = vmul.f32 %v2890_v41, %v3701_v21  ;;  %v2763_v21 = vld [vmem:[%s3906_s6 + $0x30] sm:$0xff]   ;;  %v2698_v56 = vunpack.i.h.bf16 %v2696_v58  ;;  %v2697_v59 = vunpack.i.l.bf16 %v2696_v58  ;;  %v2319_v58 = vld [vmem:[%s3907_s7] ss:$0 sm:$0xff] }
 0xaec   : > { %v1814_v37 = vmul.f32 %v2892_v50, %v3697_v18  ;;  %2590 = vmatpush3.bf16.msra.mxu0 %v2757_v35  ;;  %v2761_v18 = vld [vmem:[%s3906_s6 + $0x20] sm:$0xff]  }
 0xaed   : > { %v2894_v25 = vpop.eup %2893  ;;  %2591 = vmatprep.subr.bf16.mxu0 %v2758_v44  ;;  %v2009_v62 = vsel %vm317_vm1, %v3378_v1, %v2698_v56  ;;  %v2008_v60 = vsel %vm317_vm1, %v3374_v63, %v2697_v59  ;;  %v2712_v1 = vunpack.i.l.bf16 %v2711_v55  ;;  %v2896_v59 = vld [vmem:[%s3087_s13] sm:$0xff] }
 0xaee   : > { %v1812_v49 = vmul.f32 %v2894_v25, %v2878_v6  ;;  %v1820_v8 = vpack.c.bf16 %v1816_v53, %v1814_v37  ;;  %v2706_v39 = vpop.permute.xlu1 %2705 }
 0xaef   : > { %v2708_v57 = vunpack.i.h.bf16 %v2706_v39 }
 0xaf0   : > { %v1819_v15 = vpack.c.bf16 %v1812_v49, %v1810_v42  ;;  %2592 = vmatpush3.bf16.msra.mxu0 %v2758_v44 }
 0xaf1   : > { %2593 = vmatprep.subr.bf16.mxu0 %v2759_v10  ;;  %v2017_v0 = vsel %vm870_vm2, %v2009_v62, %v2708_v57 }
 0xaf2   : > { %2585 = vmatprep.mubr.msk.bf16.mxu0 %vm870_vm2, %v1819_v15  ;;  %v2716_v46 = vpop.permute.xlu1 %2715 }
 0xaf3   : > { %2586 = vmatmul.mubr.msk.bf16.gmra.mrb[40].mxu0 %vm870_vm2, %v1820_v8  ;;  %v2718_v49 = vunpack.i.h.bf16 %v2716_v46  ;;  %v2717_v37 = vunpack.i.l.bf16 %v2716_v46 }
 0xaf4   : > { %2594 = vmatpush3.bf16.msra.mxu0 %v2759_v10 }
 0xaf5   : > { %2595 = vmatprep.subr.bf16.mxu0 %v2760_v51 }
 0xaf8   : > { %2596 = vmatpush3.bf16.msra.mxu0 %v2760_v51 }
 0xaf9   : > { %2597 = vmatprep.subr.bf16.mxu0 %v2761_v18 }
 0xafc   : > { %2598 = vmatpush3.bf16.msra.mxu0 %v2761_v18  ;;  %v2011_v18 = vsel %vm317_vm1, %v3388_v5, %v2713_v43 }
 0xafd   : > { %2599 = vmatprep.subr.bf16.mxu0 %v2762_v26 }
 0xb00   : > { %2600 = vmatpush3.bf16.msra.mxu0 %v2762_v26  ;;  %v2010_v26 = vsel %vm317_vm1, %v3384_v3, %v2712_v1  ;;  %v2902_v1 = vld [vmem:[%s3087_s13 + $0x28] sm:$0xff] }
 0xb01   : > { %2601 = vmatprep.subr.bf16.mxu0 %v2763_v21 }
 0xb04   : > { %2602 = vmatpush3.bf16.msra.mxu0 %v2763_v21 }
 0xb05   : > { %2603 = vmatprep.subr.bf16.mxu0 %v2764_v23 }
 0xb08   : > { %2604 = vmatpush3.bf16.msra.mxu0 %v2764_v23  ;;  %v2013_v23 = vsel %vm317_vm1, %v3386_v4, %v2718_v49 }
 0xbbe   : > { %v2583_v61 = vpop.f32.mrb[36].mxu0 }
 0xbbf   : > { %v1879_v24 = vpop.f32.mrb[37].mxu0 }
 0xbc0   : > { %v2584_v17 = vpop.f32.mrb[38].mxu0 }
 0xbc1   : > { %v2719_v11 = vpack.i.bf16 %v2584_v17, %v2583_v61  ;;  %v1882_v27 = vpop.f32.mrb[39].mxu0  ;;  %v2012_v61 = vsel %vm317_vm1, %v3382_v2, %v2717_v37 }
 0xbc2   : > { %v2724_v12 = vpack.i.bf16 %v1882_v27, %v1879_v24 }
 0xbc3   : > { %2720 = vrot.lane.b32.xlu1 %v2719_v11, %s2971_s23 }
 0xbc4   : > { %2725 = vrot.lane.b32.xlu0 %v2724_v12, %s2971_s23 }
 0xbc6   : > { %v2587_v33 = vpop.f32.mrb[40].mxu0 }
 0xbc7   : > { %2735 = vrot.lane.b32.xlu1 %v2734_v34, %s2972_s24  ;;  %v1895_v47 = vpop.f32.mrb[41].mxu0  ;;  %v2702_v34 = vunpack.i.l.bf16 %v2701_v31 }
 0xbc8   : > { %2730 = vrot.lane.b32.xlu0 %v2729_v48, %s2972_s24  ;;  %v2588_v6 = vpop.f32.mrb[42].mxu0  ;;  %v2707_v48 = vunpack.i.l.bf16 %v2706_v39  ;;  %s2907_s24 = sshll.u32 %s2974_s19, 4  ;;  %s2908_s24 = int_to_ptr.vmem [resolvable:$false] %s2907_s24 }
 0xbc9   : > { %v2744_v30 = vpack.i.bf16 %v2588_v6, %v2587_v33  ;;  %v1898_v14 = vpop.f32.mrb[43].mxu0  ;;  %v2014_v20 = vsel %vm870_vm2, %v2006_v40, %v2702_v34  ;;  %v2895_v34 = vld [vmem:[%s3087_s13 + $0x10] sm:$0xff]  ;;  %v2897_v40 = vld [vmem:[%s3087_s13 + $0x18] sm:$0xff]  ;;  %s2909_s20 = scalar_lea.vmem %s2908_s24, 2048 }
 0xbca   : > { %v2739_v7 = vpack.i.bf16 %v1898_v14, %v1895_v47  ;;  %v2016_v45 = vsel %vm870_vm2, %v2008_v60, %v2707_v48 }
 0xbcb   : > { %2745 = vrot.lane.b32.xlu1 %v2744_v30, %s2971_s23 }
 0xbcc   : > { %2740 = vrot.lane.b32.xlu0 %v2739_v7, %s2971_s23  ;;  %s296_s23 = sand.u32 1, %s2957_s28  }
 0xbcd   : > { %s2267_s21 = sshll.u32 %s296_s23, 6  ;;  %s3859_s17 = scalar_lea.sflag [#allocation3], %s296_s23 }
 0xbce   : > { %s3824_s22 = scalar_lea.vmem [#allocation2], %s2267_s21 }
 0xbcf   : > { %s2201_s26 = sshll.u32 %s3824_s22, 4  ;;  %s3848_s26 = int_to_ptr.vmem [resolvable:$true] %s2201_s26 }
 0xbd0   : > { %s2903_s18 = scalar_lea.vmem %s3848_s26, 1024  ;;  %p2910_p0 = scmp.lt.s32.totalorder %s3848_s26, %s2908_s24 }
 0xbd1   : > { %p2904_p11 = scmp.ne.s32.totalorder %s3848_s26, %s2903_s18  ;;  %p2911_p1 = scmp.lt.s32.totalorder %s2909_s20, %s2903_s18 }
 0xbd3   : > { %p2905_p12 = pnand %p2904_p11, %p3060_p5  ;;  %p2912_p2 = por %p2911_p1, %p2910_p0 }
 0xbd5   : > { %p2906_p13 = pneg %p2905_p12 }
 0xbd7   : > { %p2913_p3 = pnand %p2912_p2, %p2906_p13 }
 0xc35   : > { %v2721_v16 = vpop.permute.xlu1 %2720 }
 0xc36   : > { %v2723_v36 = vunpack.i.h.bf16 %v2721_v16  ;;  %v2722_v28 = vunpack.i.l.bf16 %v2721_v16  ;;  %v2726_v13 = vpop.permute.xlu0 %2725 }
 0xc37   : > { %v2728_v22 = vunpack.i.h.bf16 %v2726_v13  ;;  %v2727_v19 = vunpack.i.l.bf16 %v2726_v13  ;;  %v2899_v13 = vld [vmem:[%s3087_s13 + $0x30] sm:$0xff] }
 0xc38   : > { %v2025_v41 = vsel %vm2022_vm3, %v2016_v45, %v2722_v28  ;;  %v2026_v50 = vsel %vm2022_vm3, %v2017_v0, %v2723_v36 }
 0xc39   : > { %v2032_v25 = vpack.c.bf16 %v2026_v50, %v2025_v41  ;;  %v2736_v53 = vpop.permute.xlu1 %2735  ;;  %v2023_v63 = vsel %vm2022_vm3, %v2014_v20, %v2727_v19  ;;  %v2024_v42 = vsel %vm2022_vm3, %v2015_v38, %v2728_v22  ;;  %v2900_v19 = vld [vmem:[%s3087_s13 + $0x20] sm:$0xff]  ;;  %v2901_v41 = vld [vmem:[%s3087_s13 + $0x38] sm:$0xff] }
 0xc3a   : > { %v2731_v15 = vpop.permute.xlu0 %2730  ;;  %v2031_v8 = vpack.c.bf16 %v2024_v42, %v2023_v63  ;;  %v2738_v35 = vunpack.i.h.bf16 %v2736_v53  ;;  %v2737_v44 = vunpack.i.l.bf16 %v2736_v53 }
 0xc3b   : > { %v2733_v10 = vunpack.i.h.bf16 %v2731_v15  ;;  %v2732_v51 = vunpack.i.l.bf16 %v2731_v15 }
 0xc3c   : > { %2605 = vmatprep.mubr.bf16.mxu0 %v2031_v8  ;;  %v2020_v27 = vsel %vm870_vm2, %v2012_v61, %v2737_v44  ;;  %v2021_v5 = vsel %vm870_vm2, %v2013_v23, %v2738_v35 }
 0xc3d   : > { %v2746_v21 = vpop.permute.xlu1 %2745  ;;  %2606 = vmatmul.mubr.bf16.vlgmr.msra.gmra.mrb[44].mxu0 %v2032_v25  ;;  %v2019_v3 = vsel %vm870_vm2, %v2011_v18, %v2733_v10  ;;  %v2018_v47 = vsel %vm870_vm2, %v2010_v26, %v2732_v51 }
 0xc3e   : > { %v2748_v24 = vunpack.i.h.bf16 %v2746_v21  ;;  %v2747_v17 = vunpack.i.l.bf16 %v2746_v21  ;;  %v2741_v11 = vpop.permute.xlu0 %2740 }
 0xc3f   : > { %v2743_v12 = vunpack.i.h.bf16 %v2741_v11  ;;  %v2742_v33 = vunpack.i.l.bf16 %v2741_v11 }
 0xc40   : > { %v2029_v4 = vsel %vm2022_vm3, %v2020_v27, %v2747_v17  ;;  %v2030_v2 = vsel %vm2022_vm3, %v2021_v5, %v2748_v24 }
 0xc41   : > { %v2027_v6 = vsel %vm2022_vm3, %v2018_v47, %v2742_v33  ;;  %v2028_v30 = vsel %vm2022_vm3, %v2019_v3, %v2743_v12  ;;  %v2034_v14 = vpack.c.bf16 %v2030_v2, %v2029_v4 }
 0xc42   : > { %v2033_v7 = vpack.c.bf16 %v2028_v30, %v2027_v6 }
 0xc44   : > { %2609 = vmatprep.mubr.bf16.mxu0 %v2033_v7 }
 0xc45   : > { %2610 = vmatmul.mubr.bf16.gmra.mrb[48].mxu0 %v2034_v14 }
 0xd10   : > { %v2607_v32 = vpop.f32.mrb[44].mxu0 }
 0xd11   : > { %v2149_v39 = vadd.f32 %v2607_v32, %v2319_v58  ;;  %v2140_v31 = vpop.f32.mrb[45].mxu0 }
 0xd12   : > { %v2141_v52 = vadd.f32 %v2319_v58, %v2140_v31  ;;  %v2608_v29 = vpop.f32.mrb[46].mxu0 }
 0xd13   : > { %v2173_v46 = vadd.f32 %v2895_v34, %v2149_v39  ;;  %v2152_v55 = vadd.f32 %v2608_v29, %v2319_v58  ;;  %v2143_v56 = vpop.f32.mrb[47].mxu0 }
 0xd14   : > { %v2171_v57 = vadd.f32 %v2896_v59, %v2141_v52  ;;  %v2144_v48 = vadd.f32 %v2319_v58, %v2143_v56 }
 0xd15   : > { %2181 = vst.msk [vmem:[%s3824_s22 + $0x10] sm:$0xff] %vm317_vm1, %v2173_v46  ;;  %v2174_v9 = vadd.f32 %v2897_v40, %v2152_v55 }
 0xd16   : > { %2179 = vst.msk [vmem:[%s3824_s22] sm:$0xff] %vm317_vm1, %v2171_v57  ;;  %v2172_v20 = vadd.f32 %v2898_v54, %v2144_v48 }
 0xd17   : > { %2182 = vst.msk [vmem:[%s3824_s22 + $0x18] sm:$0xff] %vm317_vm1, %v2174_v9 }
 0xd18   : > { %2180 = vst.msk [vmem:[%s3824_s22 + $0x8] sm:$0xff] %vm317_vm1, %v2172_v20  ;;  %v2611_v16 = vpop.f32.mrb[48].mxu0 }
 0xd19   : > { %v2165_v62 = vadd.f32 %v2611_v16, %v2319_v58  ;;  %v2156_v60 = vpop.f32.mrb[49].mxu0 }
 0xd1a   : > { %v2157_v36 = vadd.f32 %v2319_v58, %v2156_v60  ;;  %v2612_v28 = vpop.f32.mrb[50].mxu0 }
 0xd1b   : > { %v2177_v45 = vadd.f32 %v2899_v13, %v2165_v62  ;;  %v2168_v0 = vadd.f32 %v2612_v28, %v2319_v58  ;;  %v2159_v22 = vpop.f32.mrb[51].mxu0 }
 0xd1c   : > { %v2175_v38 = vadd.f32 %v2900_v19, %v2157_v36  ;;  %v2160_v43 = vadd.f32 %v2319_v58, %v2159_v22 }
 0xd1d   : > { %2185 = vst.msk [vmem:[%s3824_s22 + $0x30] sm:$0xff] %vm317_vm1, %v2177_v45  ;;  %v2178_v50 = vadd.f32 %v2901_v41, %v2168_v0 }
 0xd1e   : > { %2183 = vst.msk [vmem:[%s3824_s22 + $0x20] sm:$0xff] %vm317_vm1, %v2175_v38  ;;  %v2176_v25 = vadd.f32 %v2902_v1, %v2160_v43 }
 0xd1f   : > { %2186 = vst.msk [vmem:[%s3824_s22 + $0x38] sm:$0xff] %vm317_vm1, %v2178_v50 }
 0xd20   : > { %2184 = vst.msk [vmem:[%s3824_s22 + $0x28] sm:$0xff] %vm317_vm1, %v2176_v25 }
 0xd21   : > { %2916 = shalt.err (!%p2913_p3)
}
 0xd22   : > { %s2917_s13 = scalar_lea.hbm %s3846_s9, 1024  ;;  %s2921_s22 = scalar_lea.hbm %s3908_s8, 2048 }
 0xd23   : > { %p2918_p4 = scmp.ne.s32.totalorder %s3846_s9, %s2917_s13  ;;  %p2922_p9 = scmp.lt.u32.totalorder %s3846_s9, %s3908_s8 }
 0xd24   : > { %p2923_p10 = scmp.lt.u32.totalorder %s2921_s22, %s2917_s13  ;;  %p2925_p12 = scmp.lt.u32.totalorder %s2917_s13, %s3846_s9 }
 0xd25   : > { %p2919_p7 = pnand %p2918_p4, %p3060_p5 }
 0xd26   : > { %p2924_p11 = por %p2923_p10, %p2922_p9 }
 0xd27   : > { %p2920_p8 = pneg %p2919_p7 }
 0xd28   : > { %p2926_p13 = por %p2925_p12, %p2924_p11 }
 0xd2a   : > { %p2927_p0 = pnand %p2926_p13, %p2920_p8 }
 0xd2c   : > { %2930 = shalt.err (!%p2927_p0)
}
 0xd2d   : > { %s2975_s12 = smov 128   ;;  %s2976_s18 = smov 8  }
 0xd2e   : > { %2641 = dma.vmem_to_hbm [thread:$0]  (%p3060_p5), %s3848_s26, 1024, %s3846_s9, %s3859_s17, %s2975_s12, %s2975_s12, %s2976_s18  }
 0xd2f PF: > { %p2647_p1 = scmp.ge.s32.totalorder %s2965_s30, 2  ;;  %s2216_s19 = sand.u32 1, %s2953_s27  }
 0xd30   : > { %s2217_s24 = scalar_lea.sflag [#allocation3], %s2216_s19 }
 0xd31   : > { %p2644_p2 = pnand %p2647_p1, %p3064_p6 }
 0xd33   : > { %2948 = dma.done.wait (!%p2644_p2), %s2217_s24, 1024  }
 0xd34   : > { %2950 = vsyncadd (!%p2644_p2), %s2217_s24, 4294966272  ;;  %p18_p3 = scmp.ge.s32.totalorder %s3047_s11, 4   ;;  %s3911_s27 = smov %s2957_s28 }
 0xd35   : > { %s3912_s28 = smov %s2961_s29  ;;  %s3913_s29 = smov %s3058_s14 }
 0xd36   : > { %s3914_s30 = smov %s3047_s11  ;;  %20 = sbr.rel (!%p18_p3) target bundleno = 3 (0x3), region = 87 }
 0xd3d   :  { %2222 = vsyncpa [#allocation3], 1 }
 0xd3e   :  { %2224 = vsyncpa [#allocation3 + $0x1], 1 }

</bundles_post_ra>
